<compile_context>
chip_gen: v6e
topology: v6e:2x2x1
jax: 0.10.0
libtpu: 0.0.40
codegen_flags: <defaults>
</compile_context>

<pallas_src>
import jax
import jax.numpy as jnp
from jax.experimental import pallas as pl
from jax.experimental.pallas import tpu as pltpu

_EPS = 1e-5
_LANE = 128

# Matmul operands stay f32 to keep exact (1e-3) parity with the f32 PyTorch module at
# these tiny channel counts (the kernel is store/layout bound, not MXU bound).  For
# production channel counts flip to jnp.bfloat16 for 2x MXU throughput and half the
# weight/activation bytes; accumulation, BN and ReLU math stay f32 either way.
MATMUL_DTYPE = jnp.float32


def _round_up(x, m):
    return ((x + m - 1) // m) * m


def _bn(x):
    """Training-mode BatchNorm (weight=1, bias=0) on an (M, C) slab.

    Single-pass statistics: biased var = E[x^2] - mean^2, eps = 1e-5.
    """
    m = x.shape[0]
    inv_m = 1.0 / m
    s = jnp.sum(x, axis=0, keepdims=True)
    ss = jnp.sum(x * x, axis=0, keepdims=True)
    mean = s * inv_m
    var = jnp.maximum(ss * inv_m - mean * mean, 0.0)
    return (x - mean) * jax.lax.rsqrt(var + _EPS)


def block_kernel(xs_ref, w1r_ref, w2_ref, w3_ref, out_ref, zpad_ref):
    # xs_ref : (N, H, W, Cp)   stride-2 gathered input, channels zero-padded to Cp
    # w1r_ref: (Cp, Cp + Cop)  conv1 (first Cp cols) and residual_conv (last Cop cols)
    # w2_ref : (9*Cp, Cp)      3x3 conv weights, tap-major (im2col layout)
    # w3_ref : (Cp, Cop)       conv3
    # out_ref: (N, H, W, Cop)
    # zpad_ref: (N, H+2, W+2, Cp) scratch: spatially zero-padded conv2 input
    N, H, W, Cp = xs_ref.shape
    Cop = out_ref.shape[-1]
    M = N * H * W

    x2 = xs_ref[...].reshape(M, Cp).astype(MATMUL_DTYPE)

    # --- conv1 (1x1, stride-2 via wrapper gather) + residual conv: one fused MXU
    #     launch.  Conv biases are omitted (zero-init and cancelled by BN anyway). ----
    zr = jnp.dot(x2, w1r_ref[...].astype(MATMUL_DTYPE),
                 preferred_element_type=jnp.float32)
    z = jnp.maximum(_bn(zr[:, :Cp]), 0.0)     # bn1 + relu
    r = _bn(zr[:, Cp:])                       # residual_bn; x2 is now dead

    # --- conv2 (3x3, stride 1, pad 1): zero only the 1-element spatial border of the
    #     scratch, write the interior, then one im2col matmul. ------------------------
    zero_row = jnp.zeros((N, 1, W + 2, Cp), jnp.float32)
    zero_col = jnp.zeros((N, H, 1, Cp), jnp.float32)
    zpad_ref[:, 0:1, :, :] = zero_row
    zpad_ref[:, H + 1:H + 2, :, :] = zero_row
    zpad_ref[:, 1:H + 1, 0:1, :] = zero_col
    zpad_ref[:, 1:H + 1, W + 1:W + 2, :] = zero_col
    zpad_ref[:, 1:H + 1, 1:W + 1, :] = z.reshape(N, H, W, Cp)

    patches = jnp.concatenate(
        [zpad_ref[:, dy:dy + H, dx:dx + W, :].reshape(M, Cp)
         for dy in range(3) for dx in range(3)], axis=-1)          # (M, 9*Cp)
    z = jnp.dot(patches.astype(MATMUL_DTYPE), w2_ref[...].astype(MATMUL_DTYPE),
                preferred_element_type=jnp.float32)
    z = jnp.maximum(_bn(z), 0.0)              # bn2 + relu

    # --- conv3 (1x1) + bn3, add residual, final relu ---------------------------------
    z = jnp.dot(z.astype(MATMUL_DTYPE), w3_ref[...].astype(MATMUL_DTYPE),
                preferred_element_type=jnp.float32)
    z = _bn(z)
    out_ref[...] = jnp.maximum(z + r, 0.0).reshape(N, H, W, Cop)


def block_forward(x_nchw, params):
    """Forward pass of Block.  Input/Output are NCHW f32 to match PyTorch."""
    N, Cin, Hin, Win = x_nchw.shape
    Cout = 2 * Cin
    Cp = params["w1r"].shape[0]
    Cop = params["w3"].shape[1]
    H2, W2 = Hin // 2, Win // 2
    M = N * H2 * W2

    # One fused HBM pass: stride-2/pad-0/k=1 gather (shared by conv1 and residual_conv)
    # + NCHW->NHWC + zero-pad channels to the 128-lane width.
    xs = jnp.transpose(x_nchw[:, :, ::2, ::2], (0, 2, 3, 1))
    xs = jnp.pad(xs, ((0, 0), (0, 0), (0, 0), (0, Cp - Cin)))

    w1r, w2, w3 = params["w1r"], params["w2"], params["w3"]

    flops = 2 * M * (Cp * (Cp + Cop) + 9 * Cp * Cp + Cp * Cop)
    bytes_accessed = 4 * (xs.size + M * Cop + w1r.size + w2.size + w3.size)
    vmem_need = 4 * (xs.size + M * Cop + N * (H2 + 2) * (W2 + 2) * Cp
                     + w1r.size + w2.size + w3.size
                     + 9 * M * Cp + 4 * M * max(Cp, Cop))
    # Never lower the limit below the 32 MiB scoped default; cap at v7x's 64 MiB.
    vmem_limit = min(max(4 * vmem_need, 32 << 20), 64 << 20)

    vmem = pl.BlockSpec(memory_space=pltpu.MemorySpace.VMEM)
    out_nhwc = pl.pallas_call(
        block_kernel,
        out_shape=jax.ShapeDtypeStruct((N, H2, W2, Cop), jnp.float32),
        in_specs=[vmem, vmem, vmem, vmem],
        out_specs=vmem,
        scratch_shapes=[pltpu.VMEM((N, H2 + 2, W2 + 2, Cp), jnp.float32)],
        compiler_params=pltpu.CompilerParams(vmem_limit_bytes=vmem_limit),
        cost_estimate=pl.CostEstimate(flops=flops,
                                      transcendentals=2 * (Cp + Cop),
                                      bytes_accessed=bytes_accessed),
    )(xs, w1r, w2, w3)

    # One fused HBM pass back: drop padded channels + NHWC->NCHW.
    return jnp.transpose(out_nhwc[..., :Cout], (0, 3, 1, 2))


def init_params(key, in_channels, lane=_LANE):
    """Kaiming-normal(fan_out, relu) conv weights packed lane-dense for the kernel.

    Conv biases are zero-initialised in the PyTorch module and are mathematically
    cancelled by the training-mode BN mean subtraction, so they are not materialised.
    """
    Cin, Cout = in_channels, 2 * in_channels
    Cp = max(lane, _round_up(Cin, lane))
    Cop = max(lane, _round_up(Cout, lane))
    k1, k2, k3, k4 = jax.random.split(key, 4)

    def kaiming_oihw(k, shape):
        o, _, kh, kw = shape
        std = (2.0 / (o * kh * kw)) ** 0.5
        return std * jax.random.normal(k, shape, jnp.float32)

    w1_oihw = kaiming_oihw(k1, (Cin, Cin, 1, 1))
    w2_oihw = kaiming_oihw(k2, (Cin, Cin, 3, 3))
    w3_oihw = kaiming_oihw(k3, (Cout, Cin, 1, 1))
    wr_oihw = kaiming_oihw(k4, (Cout, Cin, 1, 1))

    def pad2(a, rows, cols):
        return jnp.pad(a, ((0, rows - a.shape[0]), (0, cols - a.shape[1])))

    w1 = pad2(w1_oihw[:, :, 0, 0].T, Cp, Cp)                       # (Cp, Cp)   (in, out)
    wr = pad2(wr_oihw[:, :, 0, 0].T, Cp, Cop)                      # (Cp, Cop)
    w2 = jnp.concatenate([pad2(w2_oihw[:, :, dy, dx].T, Cp, Cp)    # (9*Cp, Cp) tap-major
                          for dy in range(3) for dx in range(3)], axis=0)
    w3 = pad2(w3_oihw[:, :, 0, 0].T, Cp, Cop)                      # (Cp, Cop)

    params = dict(w1r=jnp.concatenate([w1, wr], axis=1), w2=w2, w3=w3)
    raw = dict(w1=w1_oihw, w2=w2_oihw, w3=w3_oihw, wr=wr_oihw)
    return params, raw


def reference_forward(x_nchw, raw):
    """Pure-JAX reference matching the PyTorch module (training-mode BN)."""
    dn = ("NCHW", "OIHW", "NCHW")
    conv = lambda x, w, s, p: jax.lax.conv_general_dilated(
        x, w, (s, s), [(p, p), (p, p)], dimension_numbers=dn)

    def bn(x):
        m = jnp.mean(x, axis=(0, 2, 3), keepdims=True)
        v = jnp.mean((x - m) ** 2, axis=(0, 2, 3), keepdims=True)
        return (x - m) * jax.lax.rsqrt(v + _EPS)

    z = jnp.maximum(bn(conv(x_nchw, raw["w1"], 2, 0)), 0.0)
    z = jnp.maximum(bn(conv(z, raw["w2"], 1, 1)), 0.0)
    z = bn(conv(z, raw["w3"], 1, 0))
    r = bn(conv(x_nchw, raw["wr"], 2, 0))
    return jnp.maximum(z + r, 0.0)


if __name__ == "__main__":
    key = jax.random.PRNGKey(0)
    kx, kp = jax.random.split(key)

    N, Cin, H, W = 2, 4, 16, 16          # out_channels = 8, output spatial 8x8
    x = jax.random.normal(kx, (N, Cin, H, W), jnp.float32)
    params, raw = init_params(kp, Cin)

    out = jax.block_until_ready(block_forward(x, params))
    assert out.shape == (N, 2 * Cin, H // 2, W // 2), out.shape

    ref = reference_forward(x, raw)
    max_err = float(jnp.max(jnp.abs(out - ref)))
    tol = 1e-3 if MATMUL_DTYPE == jnp.float32 else 5e-2
    assert max_err < tol, f"mismatch vs reference: {max_err}"

    print("KERNEL_OK")
</pallas_src>

<mosaic_0001>
module attributes {stable_mosaic.version = 11 : i64} {
  func.func @block_kernel(%arg0: memref<2x8x8x128xf32, #tpu.memory_space<vmem>>, %arg1: memref<128x256xf32, #tpu.memory_space<vmem>>, %arg2: memref<1152x128xf32, #tpu.memory_space<vmem>>, %arg3: memref<128x128xf32, #tpu.memory_space<vmem>>, %arg4: memref<2x8x8x128xf32, #tpu.memory_space<vmem>>, %arg5: memref<2x10x10x128xf32, #tpu.memory_space<vmem>>) attributes {dimension_semantics = [], scalar_prefetch = 0 : i64, scratch_operands = 1 : i64, tpu.core_type = #tpu.core_type<tc>} {
    %c0 = arith.constant 0 : index
    %c0_0 = arith.constant 0 : index
    %c0_1 = arith.constant 0 : index
    %c0_2 = arith.constant 0 : index
    %0 = vector.load %arg0[%c0, %c0_0, %c0_1, %c0_2] : memref<2x8x8x128xf32, #tpu.memory_space<vmem>>, vector<2x8x8x128xf32>
    %1 = vector.shape_cast %0 : vector<2x8x8x128xf32> to vector<128x128xf32>
    %c0_3 = arith.constant 0 : index
    %c0_4 = arith.constant 0 : index
    %2 = vector.load %arg1[%c0_3, %c0_4] : memref<128x256xf32, #tpu.memory_space<vmem>>, vector<128x256xf32>
    %cst = arith.constant dense<0.000000e+00> : vector<128x256xf32>
    %3 = tpu.matmul %1, %2, %cst {dimension_numbers = #tpu.dot_dimension_numbers<[1], [0], [0], [1], [0, 0, 1, 1], [], []>} : vector<128x128xf32>, vector<128x256xf32>, vector<128x256xf32> -> vector<128x256xf32>
    %4 = vector.extract_strided_slice %3 {offsets = [0, 0], sizes = [128, 128], strides = [1, 1]} : vector<128x256xf32> to vector<128x128xf32>
    %cst_5 = arith.constant dense<0.000000e+00> : vector<128xf32>
    %5 = vector.multi_reduction <add>, %4, %cst_5 [0] : vector<128x128xf32> to vector<128xf32>
    %6 = vector.shape_cast %5 : vector<128xf32> to vector<1x128xf32>
    %7 = arith.mulf %4, %4 : vector<128x128xf32>
    %cst_6 = arith.constant dense<0.000000e+00> : vector<128xf32>
    %8 = vector.multi_reduction <add>, %7, %cst_6 [0] : vector<128x128xf32> to vector<128xf32>
    %9 = vector.shape_cast %8 : vector<128xf32> to vector<1x128xf32>
    %cst_7 = arith.constant 7.812500e-03 : f32
    %10 = vector.broadcast %cst_7 : f32 to vector<1x128xf32>
    %11 = arith.mulf %6, %10 : vector<1x128xf32>
    %cst_8 = arith.constant 7.812500e-03 : f32
    %12 = vector.broadcast %cst_8 : f32 to vector<1x128xf32>
    %13 = arith.mulf %9, %12 : vector<1x128xf32>
    %14 = arith.mulf %11, %11 : vector<1x128xf32>
    %15 = arith.subf %13, %14 : vector<1x128xf32>
    %cst_9 = arith.constant 0.000000e+00 : f32
    %16 = vector.broadcast %cst_9 : f32 to vector<1x128xf32>
    %17 = arith.maximumf %15, %16 : vector<1x128xf32>
    %18 = vector.broadcast %11 : vector<1x128xf32> to vector<128x128xf32>
    %19 = arith.subf %4, %18 : vector<128x128xf32>
    %cst_10 = arith.constant 9.99999974E-6 : f32
    %20 = vector.broadcast %cst_10 : f32 to vector<1x128xf32>
    %21 = arith.addf %17, %20 : vector<1x128xf32>
    %22 = math.rsqrt %21 : vector<1x128xf32>
    %23 = vector.broadcast %22 : vector<1x128xf32> to vector<128x128xf32>
    %24 = arith.mulf %19, %23 : vector<128x128xf32>
    %cst_11 = arith.constant 0.000000e+00 : f32
    %25 = vector.broadcast %cst_11 : f32 to vector<128x128xf32>
    %26 = arith.maximumf %24, %25 : vector<128x128xf32>
    %27 = vector.extract_strided_slice %3 {offsets = [0, 128], sizes = [128, 128], strides = [1, 1]} : vector<128x256xf32> to vector<128x128xf32>
    %cst_12 = arith.constant dense<0.000000e+00> : vector<128xf32>
    %28 = vector.multi_reduction <add>, %27, %cst_12 [0] : vector<128x128xf32> to vector<128xf32>
    %29 = vector.shape_cast %28 : vector<128xf32> to vector<1x128xf32>
    %30 = arith.mulf %27, %27 : vector<128x128xf32>
    %cst_13 = arith.constant dense<0.000000e+00> : vector<128xf32>
    %31 = vector.multi_reduction <add>, %30, %cst_13 [0] : vector<128x128xf32> to vector<128xf32>
    %32 = vector.shape_cast %31 : vector<128xf32> to vector<1x128xf32>
    %cst_14 = arith.constant 7.812500e-03 : f32
    %33 = vector.broadcast %cst_14 : f32 to vector<1x128xf32>
    %34 = arith.mulf %29, %33 : vector<1x128xf32>
    %cst_15 = arith.constant 7.812500e-03 : f32
    %35 = vector.broadcast %cst_15 : f32 to vector<1x128xf32>
    %36 = arith.mulf %32, %35 : vector<1x128xf32>
    %37 = arith.mulf %34, %34 : vector<1x128xf32>
    %38 = arith.subf %36, %37 : vector<1x128xf32>
    %cst_16 = arith.constant 0.000000e+00 : f32
    %39 = vector.broadcast %cst_16 : f32 to vector<1x128xf32>
    %40 = arith.maximumf %38, %39 : vector<1x128xf32>
    %41 = vector.broadcast %34 : vector<1x128xf32> to vector<128x128xf32>
    %42 = arith.subf %27, %41 : vector<128x128xf32>
    %cst_17 = arith.constant 9.99999974E-6 : f32
    %43 = vector.broadcast %cst_17 : f32 to vector<1x128xf32>
    %44 = arith.addf %40, %43 : vector<1x128xf32>
    %45 = math.rsqrt %44 : vector<1x128xf32>
    %46 = vector.broadcast %45 : vector<1x128xf32> to vector<128x128xf32>
    %47 = arith.mulf %42, %46 : vector<128x128xf32>
    %cst_18 = arith.constant 0.000000e+00 : f32
    %48 = vector.broadcast %cst_18 : f32 to vector<2x1x10x128xf32>
    %cst_19 = arith.constant 0.000000e+00 : f32
    %49 = vector.broadcast %cst_19 : f32 to vector<2x8x1x128xf32>
    %c0_20 = arith.constant 0 : index
    %c0_21 = arith.constant 0 : index
    %c0_22 = arith.constant 0 : index
    %c0_23 = arith.constant 0 : index
    %50 = vector.load %arg5[%c0_20, %c0_21, %c0_22, %c0_23] : memref<2x10x10x128xf32, #tpu.memory_space<vmem>>, vector<2x1x10x128xf32>
    tpu.vector_store %arg5[%c0_20, %c0_21, %c0_22, %c0_23], %48 {strides = array<i32>} : memref<2x10x10x128xf32, #tpu.memory_space<vmem>>, vector<2x1x10x128xf32>,
    %c0_24 = arith.constant 0 : index
    %c9 = arith.constant 9 : index
    %c0_25 = arith.constant 0 : index
    %c0_26 = arith.constant 0 : index
    %51 = vector.load %arg5[%c0_24, %c9, %c0_25, %c0_26] : memref<2x10x10x128xf32, #tpu.memory_space<vmem>>, vector<2x1x10x128xf32>
    tpu.vector_store %arg5[%c0_24, %c9, %c0_25, %c0_26], %48 {strides = array<i32>} : memref<2x10x10x128xf32, #tpu.memory_space<vmem>>, vector<2x1x10x128xf32>,
    %c0_27 = arith.constant 0 : index
    %c1 = arith.constant 1 : index
    %c0_28 = arith.constant 0 : index
    %c0_29 = arith.constant 0 : index
    %52 = vector.load %arg5[%c0_27, %c1, %c0_28, %c0_29] : memref<2x10x10x128xf32, #tpu.memory_space<vmem>>, vector<2x8x1x128xf32>
    tpu.vector_store %arg5[%c0_27, %c1, %c0_28, %c0_29], %49 {strides = array<i32>} : memref<2x10x10x128xf32, #tpu.memory_space<vmem>>, vector<2x8x1x128xf32>,
    %c0_30 = arith.constant 0 : index
    %c1_31 = arith.constant 1 : index
    %c9_32 = arith.constant 9 : index
    %c0_33 = arith.constant 0 : index
    %53 = vector.load %arg5[%c0_30, %c1_31, %c9_32, %c0_33] : memref<2x10x10x128xf32, #tpu.memory_space<vmem>>, vector<2x8x1x128xf32>
    tpu.vector_store %arg5[%c0_30, %c1_31, %c9_32, %c0_33], %49 {strides = array<i32>} : memref<2x10x10x128xf32, #tpu.memory_space<vmem>>, vector<2x8x1x128xf32>,
    %54 = vector.shape_cast %26 : vector<128x128xf32> to vector<2x8x8x128xf32>
    %c0_34 = arith.constant 0 : index
    %c1_35 = arith.constant 1 : index
    %c1_36 = arith.constant 1 : index
    %c0_37 = arith.constant 0 : index
    %55 = vector.load %arg5[%c0_34, %c1_35, %c1_36, %c0_37] : memref<2x10x10x128xf32, #tpu.memory_space<vmem>>, vector<2x8x8x128xf32>
    tpu.vector_store %arg5[%c0_34, %c1_35, %c1_36, %c0_37], %54 {strides = array<i32>} : memref<2x10x10x128xf32, #tpu.memory_space<vmem>>, vector<2x8x8x128xf32>,
    %c0_38 = arith.constant 0 : index
    %c0_39 = arith.constant 0 : index
    %c0_40 = arith.constant 0 : index
    %c0_41 = arith.constant 0 : index
    %56 = vector.load %arg5[%c0_38, %c0_39, %c0_40, %c0_41] : memref<2x10x10x128xf32, #tpu.memory_space<vmem>>, vector<2x8x8x128xf32>
    %57 = vector.shape_cast %56 : vector<2x8x8x128xf32> to vector<128x128xf32>
    %c0_42 = arith.constant 0 : index
    %c0_43 = arith.constant 0 : index
    %c1_44 = arith.constant 1 : index
    %c0_45 = arith.constant 0 : index
    %58 = vector.load %arg5[%c0_42, %c0_43, %c1_44, %c0_45] : memref<2x10x10x128xf32, #tpu.memory_space<vmem>>, vector<2x8x8x128xf32>
    %59 = vector.shape_cast %58 : vector<2x8x8x128xf32> to vector<128x128xf32>
    %c0_46 = arith.constant 0 : index
    %c0_47 = arith.constant 0 : index
    %c2 = arith.constant 2 : index
    %c0_48 = arith.constant 0 : index
    %60 = vector.load %arg5[%c0_46, %c0_47, %c2, %c0_48] : memref<2x10x10x128xf32, #tpu.memory_space<vmem>>, vector<2x8x8x128xf32>
    %61 = vector.shape_cast %60 : vector<2x8x8x128xf32> to vector<128x128xf32>
    %c0_49 = arith.constant 0 : index
    %c1_50 = arith.constant 1 : index
    %c0_51 = arith.constant 0 : index
    %c0_52 = arith.constant 0 : index
    %62 = vector.load %arg5[%c0_49, %c1_50, %c0_51, %c0_52] : memref<2x10x10x128xf32, #tpu.memory_space<vmem>>, vector<2x8x8x128xf32>
    %63 = vector.shape_cast %62 : vector<2x8x8x128xf32> to vector<128x128xf32>
    %c0_53 = arith.constant 0 : index
    %c1_54 = arith.constant 1 : index
    %c1_55 = arith.constant 1 : index
    %c0_56 = arith.constant 0 : index
    %64 = vector.load %arg5[%c0_53, %c1_54, %c1_55, %c0_56] : memref<2x10x10x128xf32, #tpu.memory_space<vmem>>, vector<2x8x8x128xf32>
    %65 = vector.shape_cast %64 : vector<2x8x8x128xf32> to vector<128x128xf32>
    %c0_57 = arith.constant 0 : index
    %c1_58 = arith.constant 1 : index
    %c2_59 = arith.constant 2 : index
    %c0_60 = arith.constant 0 : index
    %66 = vector.load %arg5[%c0_57, %c1_58, %c2_59, %c0_60] : memref<2x10x10x128xf32, #tpu.memory_space<vmem>>, vector<2x8x8x128xf32>
    %67 = vector.shape_cast %66 : vector<2x8x8x128xf32> to vector<128x128xf32>
    %c0_61 = arith.constant 0 : index
    %c2_62 = arith.constant 2 : index
    %c0_63 = arith.constant 0 : index
    %c0_64 = arith.constant 0 : index
    %68 = vector.load %arg5[%c0_61, %c2_62, %c0_63, %c0_64] : memref<2x10x10x128xf32, #tpu.memory_space<vmem>>, vector<2x8x8x128xf32>
    %69 = vector.shape_cast %68 : vector<2x8x8x128xf32> to vector<128x128xf32>
    %c0_65 = arith.constant 0 : index
    %c2_66 = arith.constant 2 : index
    %c1_67 = arith.constant 1 : index
    %c0_68 = arith.constant 0 : index
    %70 = vector.load %arg5[%c0_65, %c2_66, %c1_67, %c0_68] : memref<2x10x10x128xf32, #tpu.memory_space<vmem>>, vector<2x8x8x128xf32>
    %71 = vector.shape_cast %70 : vector<2x8x8x128xf32> to vector<128x128xf32>
    %c0_69 = arith.constant 0 : index
    %c2_70 = arith.constant 2 : index
    %c2_71 = arith.constant 2 : index
    %c0_72 = arith.constant 0 : index
    %72 = vector.load %arg5[%c0_69, %c2_70, %c2_71, %c0_72] : memref<2x10x10x128xf32, #tpu.memory_space<vmem>>, vector<2x8x8x128xf32>
    %73 = vector.shape_cast %72 : vector<2x8x8x128xf32> to vector<128x128xf32>
    %74 = tpu.concatenate %57, %59, %61, %63, %65, %67, %69, %71, %73 in 1 : vector<128x128xf32>, vector<128x128xf32>, vector<128x128xf32>, vector<128x128xf32>, vector<128x128xf32>, vector<128x128xf32>, vector<128x128xf32>, vector<128x128xf32>, vector<128x128xf32> -> vector<128x1152xf32>
    %c0_73 = arith.constant 0 : index
    %c0_74 = arith.constant 0 : index
    %75 = vector.load %arg2[%c0_73, %c0_74] : memref<1152x128xf32, #tpu.memory_space<vmem>>, vector<1152x128xf32>
    %cst_75 = arith.constant dense<0.000000e+00> : vector<128x128xf32>
    %76 = tpu.matmul %74, %75, %cst_75 {dimension_numbers = #tpu.dot_dimension_numbers<[1], [0], [0], [1], [0, 0, 1, 1], [], []>} : vector<128x1152xf32>, vector<1152x128xf32>, vector<128x128xf32> -> vector<128x128xf32>
    %cst_76 = arith.constant dense<0.000000e+00> : vector<128xf32>
    %77 = vector.multi_reduction <add>, %76, %cst_76 [0] : vector<128x128xf32> to vector<128xf32>
    %78 = vector.shape_cast %77 : vector<128xf32> to vector<1x128xf32>
    %79 = arith.mulf %76, %76 : vector<128x128xf32>
    %cst_77 = arith.constant dense<0.000000e+00> : vector<128xf32>
    %80 = vector.multi_reduction <add>, %79, %cst_77 [0] : vector<128x128xf32> to vector<128xf32>
    %81 = vector.shape_cast %80 : vector<128xf32> to vector<1x128xf32>
    %cst_78 = arith.constant 7.812500e-03 : f32
    %82 = vector.broadcast %cst_78 : f32 to vector<1x128xf32>
    %83 = arith.mulf %78, %82 : vector<1x128xf32>
    %cst_79 = arith.constant 7.812500e-03 : f32
    %84 = vector.broadcast %cst_79 : f32 to vector<1x128xf32>
    %85 = arith.mulf %81, %84 : vector<1x128xf32>
    %86 = arith.mulf %83, %83 : vector<1x128xf32>
    %87 = arith.subf %85, %86 : vector<1x128xf32>
    %cst_80 = arith.constant 0.000000e+00 : f32
    %88 = vector.broadcast %cst_80 : f32 to vector<1x128xf32>
    %89 = arith.maximumf %87, %88 : vector<1x128xf32>
    %90 = vector.broadcast %83 : vector<1x128xf32> to vector<128x128xf32>
    %91 = arith.subf %76, %90 : vector<128x128xf32>
    %cst_81 = arith.constant 9.99999974E-6 : f32
    %92 = vector.broadcast %cst_81 : f32 to vector<1x128xf32>
    %93 = arith.addf %89, %92 : vector<1x128xf32>
    %94 = math.rsqrt %93 : vector<1x128xf32>
    %95 = vector.broadcast %94 : vector<1x128xf32> to vector<128x128xf32>
    %96 = arith.mulf %91, %95 : vector<128x128xf32>
    %cst_82 = arith.constant 0.000000e+00 : f32
    %97 = vector.broadcast %cst_82 : f32 to vector<128x128xf32>
    %98 = arith.maximumf %96, %97 : vector<128x128xf32>
    %c0_83 = arith.constant 0 : index
    %c0_84 = arith.constant 0 : index
    %99 = vector.load %arg3[%c0_83, %c0_84] : memref<128x128xf32, #tpu.memory_space<vmem>>, vector<128x128xf32>
    %cst_85 = arith.constant dense<0.000000e+00> : vector<128x128xf32>
    %100 = tpu.matmul %98, %99, %cst_85 {dimension_numbers = #tpu.dot_dimension_numbers<[1], [0], [0], [1], [0, 0, 1, 1], [], []>} : vector<128x128xf32>, vector<128x128xf32>, vector<128x128xf32> -> vector<128x128xf32>
    %cst_86 = arith.constant dense<0.000000e+00> : vector<128xf32>
    %101 = vector.multi_reduction <add>, %100, %cst_86 [0] : vector<128x128xf32> to vector<128xf32>
    %102 = vector.shape_cast %101 : vector<128xf32> to vector<1x128xf32>
    %103 = arith.mulf %100, %100 : vector<128x128xf32>
    %cst_87 = arith.constant dense<0.000000e+00> : vector<128xf32>
    %104 = vector.multi_reduction <add>, %103, %cst_87 [0] : vector<128x128xf32> to vector<128xf32>
    %105 = vector.shape_cast %104 : vector<128xf32> to vector<1x128xf32>
    %cst_88 = arith.constant 7.812500e-03 : f32
    %106 = vector.broadcast %cst_88 : f32 to vector<1x128xf32>
    %107 = arith.mulf %102, %106 : vector<1x128xf32>
    %cst_89 = arith.constant 7.812500e-03 : f32
    %108 = vector.broadcast %cst_89 : f32 to vector<1x128xf32>
    %109 = arith.mulf %105, %108 : vector<1x128xf32>
    %110 = arith.mulf %107, %107 : vector<1x128xf32>
    %111 = arith.subf %109, %110 : vector<1x128xf32>
    %cst_90 = arith.constant 0.000000e+00 : f32
    %112 = vector.broadcast %cst_90 : f32 to vector<1x128xf32>
    %113 = arith.maximumf %111, %112 : vector<1x128xf32>
    %114 = vector.broadcast %107 : vector<1x128xf32> to vector<128x128xf32>
    %115 = arith.subf %100, %114 : vector<128x128xf32>
    %cst_91 = arith.constant 9.99999974E-6 : f32
    %116 = vector.broadcast %cst_91 : f32 to vector<1x128xf32>
    %117 = arith.addf %113, %116 : vector<1x128xf32>
    %118 = math.rsqrt %117 : vector<1x128xf32>
    %119 = vector.broadcast %118 : vector<1x128xf32> to vector<128x128xf32>
    %120 = arith.mulf %115, %119 : vector<128x128xf32>
    %121 = arith.addf %120, %47 : vector<128x128xf32>
    %cst_92 = arith.constant 0.000000e+00 : f32
    %122 = vector.broadcast %cst_92 : f32 to vector<128x128xf32>
    %123 = arith.maximumf %121, %122 : vector<128x128xf32>
    %124 = vector.shape_cast %123 : vector<128x128xf32> to vector<2x8x8x128xf32>
    %c0_93 = arith.constant 0 : index
    %c0_94 = arith.constant 0 : index
    %c0_95 = arith.constant 0 : index
    %c0_96 = arith.constant 0 : index
    %125 = vector.load %arg4[%c0_93, %c0_94, %c0_95, %c0_96] : memref<2x8x8x128xf32, #tpu.memory_space<vmem>>, vector<2x8x8x128xf32>
    tpu.vector_store %arg4[%c0_93, %c0_94, %c0_95, %c0_96], %124 {strides = array<i32>} : memref<2x8x8x128xf32, #tpu.memory_space<vmem>>, vector<2x8x8x128xf32>,
    return
  }
}

</mosaic_0001>

<bundles_post_ra>
// kernel: tpu_custom_call.1
= control target key start
LH: loop header
LB: loop body
LE: loop exit
PB: predicated region body
PF: predicated region fallthrough
CT: control target
= control target key end

     0   :  { %9 = vsyncpa [#allocation4], 0  ;;  %s3695_s0 = inlined_call_operand.hbm [shape: f32[2,8,8,128], index: 0, kind: input, shape index: {}]   ;;  %s3696_s1 = inlined_call_operand.hbm [shape: f32[128,256], index: 1, kind: input, shape index: {}]   ;;  %s3697_s2 = inlined_call_operand.hbm [shape: f32[1152,128], index: 2, kind: input, shape index: {}]   ;;  %s3698_s3 = inlined_call_operand.hbm [shape: f32[128,128], index: 3, kind: input, shape index: {}]   ;;  %s3699_s4 = inlined_call_operand.hbm [shape: f32[2,8,8,128], index: 4, kind: output, shape index: {}]  }
   0x1   :  { %10 = vsyncpa [#allocation7], 0 }
   0x2   :  { %11 = vsyncpa [#allocation10], 0 }
   0x3   :  { %12 = vsyncpa [#allocation5], 0  ;;  %s2625_s15 = smov [#allocation6]  }
   0x4   :  { %s30_s16 = sshll.u32 %s2625_s15, 4  ;;  %s31_s16 = int_to_ptr.vmem [resolvable:$true] %s30_s16 }
   0x5   :  { %s2525_s17 = scalar_lea.vmem %s31_s16, 4096  ;;  %p2530_p1 = scmp.lt.s32.totalorder %s31_s16, %s31_s16 }
   0x6   :  { %p2526_p0 = scmp.ne.s32.totalorder %s31_s16, %s2525_s17  ;;  %p2531_p2 = scmp.lt.s32.totalorder %s2525_s17, %s2525_s17 }
   0x8   :  { %p2532_p3 = por %p2531_p2, %p2530_p1 }
   0xa   :  { %p2533_p4 = pnand %p2532_p3, %p2526_p0 }
   0xc   :  { %2536 = shalt.err (!%p2533_p4)
}
   0xd   :  { %s2626_s18 = smov 256   ;;  %s2627_s19 = smov 16  }
   0xe   :  { %36 = dma.hbm_to_vmem [thread:$0]  %s3696_s1, 4096, %s31_s16, [#allocation7], %s2626_s18, %s2626_s18, %s2627_s19  }
   0xf   :  { %s2628_s22 = smov [#allocation3]  }
  0x10   :  { %s18_s23 = sshll.u32 %s2628_s22, 4  ;;  %s19_s23 = int_to_ptr.vmem [resolvable:$true] %s18_s23 }
  0x11   :  { %s2545_s24 = scalar_lea.vmem %s19_s23, 2048  ;;  %p2550_p6 = scmp.lt.s32.totalorder %s19_s23, %s19_s23 }
  0x12   :  { %p2546_p5 = scmp.ne.s32.totalorder %s19_s23, %s2545_s24  ;;  %p2551_p7 = scmp.lt.s32.totalorder %s2545_s24, %s2545_s24 }
  0x14   :  { %p2552_p8 = por %p2551_p7, %p2550_p6 }
  0x16   :  { %p2553_p9 = pnand %p2552_p8, %p2546_p5 }
  0x18   :  { %2556 = shalt.err (!%p2553_p9)
}
  0x19   :  { %s2629_s25 = smov 128   ;;  %s2630_s26 = smov 8  }
  0x1a   :  { %24 = dma.hbm_to_vmem [thread:$0]  %s3695_s0, 2048, %s19_s23, [#allocation4], %s2629_s25, %s2629_s25, %s2630_s26  }
  0x1b   :  { %s2631_s1 = smov [#allocation8]   ;;  %s2632_s30 = smov [#allocation9]  }
  0x1c   :  { %s42_s29 = sshll.u32 %s2631_s1, 4  ;;  %s54_s5 = sshll.u32 %s2632_s30, 4  ;;  %s43_s29 = int_to_ptr.vmem [resolvable:$true] %s42_s29  ;;  %s55_s5 = int_to_ptr.vmem [resolvable:$true] %s54_s5 }
  0x1d   :  { %s2565_s6 = scalar_lea.vmem %s43_s29, 18432  ;;  %p2570_p11 = scmp.lt.s32.totalorder %s43_s29, %s43_s29 }
  0x1e   :  { %p2566_p10 = scmp.ne.s32.totalorder %s43_s29, %s2565_s6  ;;  %p2571_p12 = scmp.lt.s32.totalorder %s2565_s6, %s2565_s6 }
  0x20   :  { %p2572_p13 = por %p2571_p12, %p2570_p11 }
  0x22   :  { %p2573_p0 = pnand %p2572_p13, %p2566_p10 }
  0x24   :  { %2576 = shalt.err (!%p2573_p0)
}
  0x25   :  { %48 = dma.hbm_to_vmem [thread:$0]  %s3697_s2, 18432, %s43_s29, [#allocation7], %s2629_s25, %s2629_s25, %s2630_s26  }
  0x26   :  { %s2585_s0 = scalar_lea.vmem %s55_s5, 2048  ;;  %p2590_p2 = scmp.lt.s32.totalorder %s55_s5, %s55_s5 }
  0x27   :  { %p2586_p1 = scmp.ne.s32.totalorder %s55_s5, %s2585_s0  ;;  %p2591_p3 = scmp.lt.s32.totalorder %s2585_s0, %s2585_s0 }
  0x29   :  { %p2592_p4 = por %p2591_p3, %p2590_p2 }
  0x2b   :  { %p2593_p5 = pnand %p2592_p4, %p2586_p1 }
  0x2d   :  { %2596 = shalt.err (!%p2593_p5)
}
  0x2e   :  { %60 = dma.hbm_to_vmem [thread:$0]  %s3698_s3, 2048, %s55_s5, [#allocation10], %s2629_s25, %s2629_s25, %s2630_s26  }
  0x2f   :  { %2617 = dma.done.wait [#allocation4], 2048  }
  0x30   :  { %2618 = vsyncadd [#allocation4], 4294965248 }
  0x31   :  { %2619 = dma.done.wait [#allocation7], 22528  }
  0x32   :  { %2620 = vsyncadd [#allocation7], 4294944768 }
  0x33   :  { %2621 = dma.done.wait [#allocation10], 2048  }
  0x34   :  { %2622 = vsyncadd [#allocation10], 4294965248  ;;  %v2633_v0 = vmov 0.0   ;;  %v120_v1 = vld [vmem:[#allocation6 + $0xf8] sm:$0xff]  ;;  %v119_v2 = vld [vmem:[#allocation6 + $0xf0] sm:$0xff]  ;;  %s2634_s2 = smov [#allocation11]  }
  0x35   :  { %185 = vmatprep.mubr.f32.mxu0 %v2633_v0  ;;  %492 = vst [vmem:[#allocation2] sm:$0xff] %v2633_v0  ;;  %493 = vst [vmem:[#allocation2 + $0x8] sm:$0x3] %v2633_v0  ;;  %v118_v3 = vld [vmem:[#allocation6 + $0xe8] sm:$0xff]  ;;  %121 = vmatprep.subr.mxu0 %v120_v1  ;;  %v117_v4 = vld [vmem:[#allocation6 + $0xe0] sm:$0xff]  ;;  %s1988_s3 = sshll.u32 %s2634_s2, 4  ;;  %s1989_s3 = int_to_ptr.vmem [resolvable:$true] %s1988_s3 }
  0x36   :  { %494 = vst [vmem:[#allocation2 + $0xa0] sm:$0xff] %v2633_v0  ;;  %495 = vst [vmem:[#allocation2 + $0xa8] sm:$0x3] %v2633_v0  ;;  %122 = vmatpush1.msra.mxu0 %v119_v2  ;;  %v116_v5 = vld [vmem:[#allocation6 + $0xd8] sm:$0xff]  ;;  %v115_v6 = vld [vmem:[#allocation6 + $0xd0] sm:$0xff]  ;;  %s2597_s11 = scalar_lea.vmem %s1989_s3, 2048  ;;  %p2602_p7 = scmp.lt.s32.totalorder %s1989_s3, %s1989_s3 }
  0x37   :  { %497 = vst [vmem:[#allocation2 + $0x90] sm:$0xff] %v2633_v0  ;;  %498 = vst [vmem:[#allocation2 + $0x98] sm:$0x3] %v2633_v0  ;;  %123 = vmatprep.subr.mxu0 %v118_v3  ;;  %v114_v7 = vld [vmem:[#allocation6 + $0xc8] sm:$0xff]  ;;  %v113_v8 = vld [vmem:[#allocation6 + $0xc0] sm:$0xff]  ;;  %p2598_p6 = scmp.ne.s32.totalorder %s1989_s3, %s2597_s11  ;;  %p2603_p8 = scmp.lt.s32.totalorder %s2597_s11, %s2597_s11 }
  0x38   :  { %499 = vst [vmem:[#allocation2 + $0x130] sm:$0xff] %v2633_v0  ;;  %500 = vst [vmem:[#allocation2 + $0x138] sm:$0x3] %v2633_v0  ;;  %124 = vmatpush1.msra.mxu0 %v117_v4  ;;  %v112_v9 = vld [vmem:[#allocation6 + $0xb8] sm:$0xff]  ;;  %v111_v10 = vld [vmem:[#allocation6 + $0xb0] sm:$0xff] }
  0x39   :  { %502 = vst [vmem:[#allocation2 + $0x10] sm:$0x1] %v2633_v0  ;;  %503 = vst [vmem:[#allocation2 + $0x20] sm:$0x1] %v2633_v0  ;;  %125 = vmatprep.subr.mxu0 %v116_v5  ;;  %v110_v11 = vld [vmem:[#allocation6 + $0xa8] sm:$0xff]  ;;  %v109_v12 = vld [vmem:[#allocation6 + $0xa0] sm:$0xff]  ;;  %p2604_p9 = por %p2603_p8, %p2602_p7 }
  0x3a   :  { %504 = vst [vmem:[#allocation2 + $0x30] sm:$0x1] %v2633_v0  ;;  %505 = vst [vmem:[#allocation2 + $0x40] sm:$0x1] %v2633_v0  ;;  %126 = vmatpush1.msra.mxu0 %v115_v6  ;;  %v108_v13 = vld [vmem:[#allocation6 + $0x98] sm:$0xff]  ;;  %v107_v14 = vld [vmem:[#allocation6 + $0x90] sm:$0xff] }
  0x3b   :  { %506 = vst [vmem:[#allocation2 + $0x50] sm:$0x1] %v2633_v0  ;;  %507 = vst [vmem:[#allocation2 + $0x60] sm:$0x1] %v2633_v0  ;;  %127 = vmatprep.subr.mxu0 %v114_v7  ;;  %v106_v15 = vld [vmem:[#allocation6 + $0x88] sm:$0xff]  ;;  %v105_v16 = vld [vmem:[#allocation6 + $0x80] sm:$0xff]  ;;  %p2605_p10 = pnand %p2604_p9, %p2598_p6 }
  0x3c   :  { %508 = vst [vmem:[#allocation2 + $0x70] sm:$0x1] %v2633_v0  ;;  %509 = vst [vmem:[#allocation2 + $0x80] sm:$0x1] %v2633_v0  ;;  %128 = vmatpush1.msra.mxu0 %v113_v8  ;;  %v104_v17 = vld [vmem:[#allocation6 + $0x78] sm:$0xff]  ;;  %v103_v18 = vld [vmem:[#allocation6 + $0x70] sm:$0xff] }
  0x3d   :  { %510 = vst [vmem:[#allocation2 + $0xb0] sm:$0x1] %v2633_v0  ;;  %511 = vst [vmem:[#allocation2 + $0xc0] sm:$0x1] %v2633_v0  ;;  %129 = vmatprep.subr.mxu0 %v112_v9  ;;  %v102_v19 = vld [vmem:[#allocation6 + $0x68] sm:$0xff]  ;;  %v101_v20 = vld [vmem:[#allocation6 + $0x60] sm:$0xff] }
  0x3e   :  { %512 = vst [vmem:[#allocation2 + $0xd0] sm:$0x1] %v2633_v0  ;;  %513 = vst [vmem:[#allocation2 + $0xe0] sm:$0x1] %v2633_v0  ;;  %130 = vmatpush1.msra.mxu0 %v111_v10  ;;  %v100_v21 = vld [vmem:[#allocation6 + $0x58] sm:$0xff]  ;;  %v99_v22 = vld [vmem:[#allocation6 + $0x50] sm:$0xff] }
  0x3f   :  { %514 = vst [vmem:[#allocation2 + $0xf0] sm:$0x1] %v2633_v0  ;;  %515 = vst [vmem:[#allocation2 + $0x100] sm:$0x1] %v2633_v0  ;;  %131 = vmatprep.subr.mxu0 %v110_v11  ;;  %v98_v23 = vld [vmem:[#allocation6 + $0x48] sm:$0xff]  ;;  %v97_v24 = vld [vmem:[#allocation6 + $0x40] sm:$0xff] }
  0x40   :  { %516 = vst [vmem:[#allocation2 + $0x110] sm:$0x1] %v2633_v0  ;;  %517 = vst [vmem:[#allocation2 + $0x120] sm:$0x1] %v2633_v0  ;;  %132 = vmatpush1.msra.mxu0 %v109_v12  ;;  %v96_v25 = vld [vmem:[#allocation6 + $0x38] sm:$0xff]  ;;  %v95_v26 = vld [vmem:[#allocation6 + $0x30] sm:$0xff] }
  0x41   :  { %518 = vst [vmem:[#allocation2 + $0x19] sm:$0x1] %v2633_v0  ;;  %519 = vst [vmem:[#allocation2 + $0x29] sm:$0x1] %v2633_v0  ;;  %133 = vmatprep.subr.mxu0 %v108_v13  ;;  %v94_v27 = vld [vmem:[#allocation6 + $0x28] sm:$0xff]  ;;  %v93_v28 = vld [vmem:[#allocation6 + $0x20] sm:$0xff] }
  0x42   :  { %520 = vst [vmem:[#allocation2 + $0x39] sm:$0x1] %v2633_v0  ;;  %521 = vst [vmem:[#allocation2 + $0x49] sm:$0x1] %v2633_v0  ;;  %134 = vmatpush1.msra.mxu0 %v107_v14  ;;  %v92_v29 = vld [vmem:[#allocation6 + $0x18] sm:$0xff]  ;;  %v91_v30 = vld [vmem:[#allocation6 + $0x10] sm:$0xff] }
  0x43   :  { %522 = vst [vmem:[#allocation2 + $0x59] sm:$0x1] %v2633_v0  ;;  %523 = vst [vmem:[#allocation2 + $0x69] sm:$0x1] %v2633_v0  ;;  %135 = vmatprep.subr.mxu0 %v106_v15  ;;  %v90_v31 = vld [vmem:[#allocation6 + $0x8] sm:$0xff]  ;;  %v89_v32 = vld [vmem:[#allocation6] sm:$0xff] }
  0x44   :  { %524 = vst [vmem:[#allocation2 + $0x79] sm:$0x1] %v2633_v0  ;;  %525 = vst [vmem:[#allocation2 + $0x89] sm:$0x1] %v2633_v0  ;;  %136 = vmatpush1.msra.mxu0 %v105_v16  ;;  %v73_v33 = vld [vmem:[#allocation3] sm:$0xff]  ;;  %v74_v34 = vld [vmem:[#allocation3 + $0x8] sm:$0xff] }
  0x45   :  { %526 = vst [vmem:[#allocation2 + $0xb9] sm:$0x1] %v2633_v0  ;;  %527 = vst [vmem:[#allocation2 + $0xc9] sm:$0x1] %v2633_v0  ;;  %137 = vmatprep.subr.mxu0 %v104_v17  ;;  %v75_v35 = vld [vmem:[#allocation3 + $0x10] sm:$0xff]  ;;  %v76_v36 = vld [vmem:[#allocation3 + $0x18] sm:$0xff] }
  0x46   :  { %528 = vst [vmem:[#allocation2 + $0xd9] sm:$0x1] %v2633_v0  ;;  %529 = vst [vmem:[#allocation2 + $0xe9] sm:$0x1] %v2633_v0  ;;  %138 = vmatpush1.msra.mxu0 %v103_v18  ;;  %v77_v37 = vld [vmem:[#allocation3 + $0x20] sm:$0xff]  ;;  %v78_v38 = vld [vmem:[#allocation3 + $0x28] sm:$0xff] }
  0x47   :  { %530 = vst [vmem:[#allocation2 + $0xf9] sm:$0x1] %v2633_v0  ;;  %531 = vst [vmem:[#allocation2 + $0x109] sm:$0x1] %v2633_v0  ;;  %139 = vmatprep.subr.mxu0 %v102_v19  ;;  %v79_v39 = vld [vmem:[#allocation3 + $0x30] sm:$0xff]  ;;  %v80_v40 = vld [vmem:[#allocation3 + $0x38] sm:$0xff] }
  0x48   :  { %532 = vst [vmem:[#allocation2 + $0x119] sm:$0x1] %v2633_v0  ;;  %533 = vst [vmem:[#allocation2 + $0x129] sm:$0x1] %v2633_v0  ;;  %140 = vmatpush1.msra.mxu0 %v101_v20  ;;  %v81_v41 = vld [vmem:[#allocation3 + $0x40] sm:$0xff]  ;;  %v82_v42 = vld [vmem:[#allocation3 + $0x48] sm:$0xff] }
  0x49   :  { %141 = vmatprep.subr.mxu0 %v100_v21  ;;  %v83_v43 = vld [vmem:[#allocation3 + $0x50] sm:$0xff]  ;;  %v84_v44 = vld [vmem:[#allocation3 + $0x58] sm:$0xff]  ;;  %v85_v45 = vld [vmem:[#allocation3 + $0x60] sm:$0xff] }
  0x4a   :  { %142 = vmatpush1.msra.mxu0 %v99_v22  ;;  %v86_v46 = vld [vmem:[#allocation3 + $0x68] sm:$0xff]  ;;  %v87_v47 = vld [vmem:[#allocation3 + $0x70] sm:$0xff]  ;;  %v88_v48 = vld [vmem:[#allocation3 + $0x78] sm:$0xff] }
  0x4b   :  { %143 = vmatprep.subr.mxu0 %v98_v23  ;;  %v726_v49 = vld [vmem:[#allocation8 + $0xf8] sm:$0xff]  ;;  %v725_v51 = vld [vmem:[#allocation8 + $0xf0] sm:$0xff]  ;;  %v724_v53 = vld [vmem:[#allocation8 + $0xe8] sm:$0xff] }
  0x4c   :  { %144 = vmatpush1.msra.mxu0 %v97_v24  ;;  %2002 = vmatprep.subr.mxu1 %v726_v49  ;;  %v710_v50 = vld [vmem:[#allocation8 + $0x78] sm:$0xff]  ;;  %v709_v52 = vld [vmem:[#allocation8 + $0x70] sm:$0xff]  ;;  %v708_v54 = vld [vmem:[#allocation8 + $0x68] sm:$0xff] }
  0x4d   :  { %145 = vmatprep.subr.mxu0 %v96_v25  ;;  %2003 = vmatpush3.msra.mxu1 %v710_v50  ;;  %v723_v55 = vld [vmem:[#allocation8 + $0xe0] sm:$0xff]  ;;  %v722_v57 = vld [vmem:[#allocation8 + $0xd8] sm:$0xff]  ;;  %v721_v60 = vld [vmem:[#allocation8 + $0xd0] sm:$0xff] }
  0x4e   :  { %146 = vmatpush1.msra.mxu0 %v95_v26  ;;  %2004 = vmatprep.subr.mxu1 %v725_v51  ;;  %v707_v56 = vld [vmem:[#allocation8 + $0x60] sm:$0xff]  ;;  %v706_v58 = vld [vmem:[#allocation8 + $0x58] sm:$0xff]  ;;  %v705_v62 = vld [vmem:[#allocation8 + $0x50] sm:$0xff] }
  0x4f   :  { %147 = vmatprep.subr.mxu0 %v94_v27  ;;  %2005 = vmatpush3.msra.mxu1 %v709_v52  ;;  %v758_v59 = vld [vmem:[#allocation8 + $0x1f8] sm:$0xff]  ;;  %v757_v63 = vld [vmem:[#allocation8 + $0x1f0] sm:$0xff]  ;;  %v720_v1 = vld [vmem:[#allocation8 + $0xc8] sm:$0xff] }
  0x50   :  { %148 = vmatpush1.msra.mxu0 %v93_v28  ;;  %2006 = vmatprep.subr.mxu1 %v724_v53  ;;  %v742_v61 = vld [vmem:[#allocation8 + $0x178] sm:$0xff]  ;;  %v741_v2 = vld [vmem:[#allocation8 + $0x170] sm:$0xff]  ;;  %v704_v3 = vld [vmem:[#allocation8 + $0x48] sm:$0xff] }
  0x51   :  { %149 = vmatprep.subr.mxu0 %v92_v29  ;;  %2007 = vmatpush3.msra.mxu1 %v708_v54  ;;  %v756_v4 = vld [vmem:[#allocation8 + $0x1e8] sm:$0xff]  ;;  %v719_v5 = vld [vmem:[#allocation8 + $0xc0] sm:$0xff]  ;;  %v718_v9 = vld [vmem:[#allocation8 + $0xb8] sm:$0xff] }
  0x52   :  { %150 = vmatpush1.msra.mxu0 %v91_v30  ;;  %2008 = vmatprep.subr.mxu1 %v723_v55  ;;  %v740_v6 = vld [vmem:[#allocation8 + $0x168] sm:$0xff]  ;;  %v703_v7 = vld [vmem:[#allocation8 + $0x40] sm:$0xff]  ;;  %v702_v11 = vld [vmem:[#allocation8 + $0x38] sm:$0xff] }
  0x53   :  { %151 = vmatprep.subr.mxu0 %v90_v31  ;;  %2009 = vmatpush3.msra.mxu1 %v707_v56  ;;  %v755_v8 = vld [vmem:[#allocation8 + $0x1e0] sm:$0xff]  ;;  %v754_v12 = vld [vmem:[#allocation8 + $0x1d8] sm:$0xff]  ;;  %v717_v13 = vld [vmem:[#allocation8 + $0xb0] sm:$0xff] }
  0x54   :  { %152 = vmatpush1.msra.mxu0 %v89_v32  ;;  %2010 = vmatprep.subr.mxu1 %v722_v57  ;;  %v739_v10 = vld [vmem:[#allocation8 + $0x160] sm:$0xff]  ;;  %v738_v14 = vld [vmem:[#allocation8 + $0x158] sm:$0xff]  ;;  %v701_v15 = vld [vmem:[#allocation8 + $0x30] sm:$0xff] }
  0x55   :  { %186 = vmatmul.mubr.f32.vlgmr.msra.gmra.mxu0 %v73_v33  ;;  %2011 = vmatpush3.msra.mxu1 %v706_v58  ;;  %v753_v16 = vld [vmem:[#allocation8 + $0x1d0] sm:$0xff]  ;;  %v716_v17 = vld [vmem:[#allocation8 + $0xa8] sm:$0xff]  ;;  %v715_v21 = vld [vmem:[#allocation8 + $0xa0] sm:$0xff] }
  0x56   :  { %191 = vmatprep.mubr.f32.mxu0 %v2633_v0  ;;  %2082 = vmatprep.subr.mxu0 %v758_v59  ;;  %v737_v18 = vld [vmem:[#allocation8 + $0x150] sm:$0xff]  ;;  %v700_v19 = vld [vmem:[#allocation8 + $0x28] sm:$0xff]  ;;  %v699_v23 = vld [vmem:[#allocation8 + $0x20] sm:$0xff] }
  0x57   :  { %2012 = vmatprep.subr.mxu1 %v721_v60  ;;  %2083 = vmatpush3.msra.mxu0 %v742_v61  ;;  %v752_v20 = vld [vmem:[#allocation8 + $0x1c8] sm:$0xff]  ;;  %v751_v24 = vld [vmem:[#allocation8 + $0x1c0] sm:$0xff]  ;;  %v714_v25 = vld [vmem:[#allocation8 + $0x98] sm:$0xff] }
  0x58   :  { %2013 = vmatpush3.msra.mxu1 %v705_v62  ;;  %2084 = vmatprep.subr.mxu0 %v757_v63  ;;  %v736_v22 = vld [vmem:[#allocation8 + $0x148] sm:$0xff]  ;;  %v735_v26 = vld [vmem:[#allocation8 + $0x140] sm:$0xff]  ;;  %v698_v27 = vld [vmem:[#allocation8 + $0x18] sm:$0xff] }
  0x59   :  { %192 = vmatmul.mubr.f32.gmra.mxu0 %v74_v34  ;;  %2014 = vmatprep.subr.mxu1 %v720_v1  ;;  %v750_v28 = vld [vmem:[#allocation8 + $0x1b8] sm:$0xff]  ;;  %v713_v29 = vld [vmem:[#allocation8 + $0x90] sm:$0xff]  ;;  %v712_v33 = vld [vmem:[#allocation8 + $0x88] sm:$0xff] }
  0x5a   :  { %197 = vmatprep.mubr.f32.mxu0 %v2633_v0  ;;  %2085 = vmatpush3.msra.mxu0 %v741_v2  ;;  %v734_v30 = vld [vmem:[#allocation8 + $0x138] sm:$0xff]  ;;  %v697_v31 = vld [vmem:[#allocation8 + $0x10] sm:$0xff]  ;;  %v744_v49 = vld [vmem:[#allocation8 + $0x188] sm:$0xff] }
  0x5b   :  { %2015 = vmatpush3.msra.mxu1 %v704_v3  ;;  %2086 = vmatprep.subr.mxu0 %v756_v4  ;;  %v749_v32 = vld [vmem:[#allocation8 + $0x1b0] sm:$0xff]  ;;  %v728_v50 = vld [vmem:[#allocation8 + $0x108] sm:$0xff]  ;;  %v743_v51 = vld [vmem:[#allocation8 + $0x180] sm:$0xff] }
  0x5c   :  { %2016 = vmatprep.subr.mxu1 %v719_v5  ;;  %2087 = vmatpush3.msra.mxu0 %v740_v6  ;;  %v733_v34 = vld [vmem:[#allocation8 + $0x130] sm:$0xff]  ;;  %v727_v52 = vld [vmem:[#allocation8 + $0x100] sm:$0xff]  ;;  %v788_v54 = vld [vmem:[#allocation8 + $0x2e8] sm:$0xff] }
  0x5d   :  { %198 = vmatmul.mubr.f32.gmra.mxu0 %v75_v35  ;;  %2017 = vmatpush3.msra.mxu1 %v703_v7  ;;  %v696_v35 = vld [vmem:[#allocation8 + $0x8] sm:$0xff]  ;;  %v789_v53 = vld [vmem:[#allocation8 + $0x2f0] sm:$0xff]  ;;  %v787_v56 = vld [vmem:[#allocation8 + $0x2e0] sm:$0xff] }
  0x5e   :  { %203 = vmatprep.mubr.f32.mxu0 %v2633_v0  ;;  %2088 = vmatprep.subr.mxu0 %v755_v8  ;;  %v772_v55 = vld [vmem:[#allocation8 + $0x268] sm:$0xff]  ;;  %v771_v57 = vld [vmem:[#allocation8 + $0x260] sm:$0xff]  ;;  %v786_v58 = vld [vmem:[#allocation8 + $0x2d8] sm:$0xff] }
  0x5f   :  { %2018 = vmatprep.subr.mxu1 %v718_v9  ;;  %2089 = vmatpush3.msra.mxu0 %v739_v10  ;;  %v770_v59 = vld [vmem:[#allocation8 + $0x258] sm:$0xff]  ;;  %v785_v60 = vld [vmem:[#allocation8 + $0x2d0] sm:$0xff]  ;;  %v784_v63 = vld [vmem:[#allocation8 + $0x2c8] sm:$0xff] }
  0x60   :  { %2019 = vmatpush3.msra.mxu1 %v702_v11  ;;  %2090 = vmatprep.subr.mxu0 %v754_v12  ;;  %v769_v62 = vld [vmem:[#allocation8 + $0x250] sm:$0xff]  ;;  %v768_v3 = vld [vmem:[#allocation8 + $0x248] sm:$0xff]  ;;  %v783_v4 = vld [vmem:[#allocation8 + $0x2c0] sm:$0xff] }
  0x61   :  { %204 = vmatmul.mubr.f32.gmra.mxu0 %v76_v36  ;;  %2020 = vmatprep.subr.mxu1 %v717_v13  ;;  %v748_v36 = vld [vmem:[#allocation8 + $0x1a8] sm:$0xff]  ;;  %v767_v7 = vld [vmem:[#allocation8 + $0x240] sm:$0xff]  ;;  %v822_v8 = vld [vmem:[#allocation8 + $0x3f8] sm:$0xff] }
  0x62   :  { %209 = vmatprep.mubr.f32.mxu0 %v2633_v0  ;;  %2091 = vmatpush3.msra.mxu0 %v738_v14  ;;  %v782_v10 = vld [vmem:[#allocation8 + $0x2b8] sm:$0xff]  ;;  %v781_v13 = vld [vmem:[#allocation8 + $0x2b0] sm:$0xff] }
  0x63   :  { %2021 = vmatpush3.msra.mxu1 %v701_v15  ;;  %2092 = vmatprep.subr.mxu0 %v753_v16  ;;  %v766_v12 = vld [vmem:[#allocation8 + $0x238] sm:$0xff] }
  0x64   :  { %2022 = vmatprep.subr.mxu1 %v716_v17  ;;  %2093 = vmatpush3.msra.mxu0 %v737_v18  ;;  %v765_v17 = vld [vmem:[#allocation8 + $0x230] sm:$0xff] }
  0x65   :  { %210 = vmatmul.mubr.f32.gmra.mxu0 %v77_v37  ;;  %2023 = vmatpush3.msra.mxu1 %v700_v19  ;;  %v711_v37 = vld [vmem:[#allocation8 + $0x80] sm:$0xff] }
  0x66   :  { %215 = vmatprep.mubr.f32.mxu0 %v2633_v0  ;;  %2094 = vmatprep.subr.mxu0 %v752_v20 }
  0x67   :  { %2024 = vmatprep.subr.mxu1 %v715_v21  ;;  %2095 = vmatpush3.msra.mxu0 %v736_v22  ;;  %v780_v21 = vld [vmem:[#allocation8 + $0x2a8] sm:$0xff] }
  0x68   :  { %2025 = vmatpush3.msra.mxu1 %v699_v23  ;;  %2096 = vmatprep.subr.mxu0 %v751_v24 }
  0x69   :  { %216 = vmatmul.mubr.f32.gmra.mxu0 %v78_v38  ;;  %2026 = vmatprep.subr.mxu1 %v714_v25  ;;  %v732_v38 = vld [vmem:[#allocation8 + $0x128] sm:$0xff] }
  0x6a   :  { %221 = vmatprep.mubr.f32.mxu0 %v2633_v0  ;;  %2097 = vmatpush3.msra.mxu0 %v735_v26 }
  0x6b   :  { %2027 = vmatpush3.msra.mxu1 %v698_v27  ;;  %2098 = vmatprep.subr.mxu0 %v750_v28  ;;  %v764_v27 = vld [vmem:[#allocation8 + $0x228] sm:$0xff] }
  0x6c   :  { %2028 = vmatprep.subr.mxu1 %v713_v29  ;;  %2099 = vmatpush3.msra.mxu0 %v734_v30 }
  0x6d   :  { %222 = vmatmul.mubr.f32.gmra.mxu0 %v79_v39  ;;  %2029 = vmatpush3.msra.mxu1 %v697_v31  ;;  %v695_v39 = vld [vmem:[#allocation8] sm:$0xff] }
  0x6e   :  { %227 = vmatprep.mubr.f32.mxu0 %v2633_v0  ;;  %2100 = vmatprep.subr.mxu0 %v749_v32  ;;  %v779_v31 = vld [vmem:[#allocation8 + $0x2a0] sm:$0xff] }
  0x6f   :  { %2030 = vmatprep.subr.mxu1 %v712_v33  ;;  %2101 = vmatpush3.msra.mxu0 %v733_v34 }
  0x70   :  { %2031 = vmatpush3.msra.mxu1 %v696_v35  ;;  %2102 = vmatprep.subr.mxu0 %v748_v36 }
  0x71   :  { %228 = vmatmul.mubr.f32.gmra.mxu0 %v80_v40  ;;  %2032 = vmatprep.subr.mxu1 %v711_v37  ;;  %v566_v40 = vld [vmem:[#allocation2 + $0x1] sm:$0xff] }
  0x72   :  { %233 = vmatprep.mubr.f32.mxu0 %v2633_v0  ;;  %2103 = vmatpush3.msra.mxu0 %v732_v38  ;;  %v763_v37 = vld [vmem:[#allocation8 + $0x220] sm:$0xff] }
  0x73   :  { %2033 = vmatpush3.msra.mxu1 %v695_v39  ;;  %903 = vmatprep.mubr.f32.mxu1 %v566_v40  ;;  %v778_v40 = vld [vmem:[#allocation8 + $0x298] sm:$0xff] }
  0x74   :  { %904 = vmatmul.mubr.f32.vlgmr.msra.gmra.mxu1 %v2633_v0 }
  0x75   :  { %234 = vmatmul.mubr.f32.gmra.mxu0 %v81_v41  ;;  %v747_v41 = vld [vmem:[#allocation8 + $0x1a0] sm:$0xff] }
  0x76   :  { %239 = vmatprep.mubr.f32.mxu0 %v2633_v0  ;;  %2104 = vmatprep.subr.mxu0 %v747_v41 }
  0x79   :  { %240 = vmatmul.mubr.f32.gmra.mxu0 %v82_v42  ;;  %v731_v42 = vld [vmem:[#allocation8 + $0x120] sm:$0xff] }
  0x7a   :  { %245 = vmatprep.mubr.f32.mxu0 %v2633_v0  ;;  %2105 = vmatpush3.msra.mxu0 %v731_v42 }
  0x7d   :  { %246 = vmatmul.mubr.f32.gmra.mxu0 %v83_v43  ;;  %v746_v43 = vld [vmem:[#allocation8 + $0x198] sm:$0xff] }
  0x7e   :  { %251 = vmatprep.mubr.f32.mxu0 %v2633_v0  ;;  %2106 = vmatprep.subr.mxu0 %v746_v43 }
  0x81   :  { %252 = vmatmul.mubr.f32.gmra.mxu0 %v84_v44  ;;  %v730_v44 = vld [vmem:[#allocation8 + $0x118] sm:$0xff] }
  0x82   :  { %257 = vmatprep.mubr.f32.mxu0 %v2633_v0  ;;  %2107 = vmatpush3.msra.mxu0 %v730_v44 }
  0x85   :  { %258 = vmatmul.mubr.f32.gmra.mxu0 %v85_v45  ;;  %v745_v45 = vld [vmem:[#allocation8 + $0x190] sm:$0xff] }
  0x86   :  { %263 = vmatprep.mubr.f32.mxu0 %v2633_v0  ;;  %2108 = vmatprep.subr.mxu0 %v745_v45 }
  0x89   :  { %264 = vmatmul.mubr.f32.gmra.mxu0 %v86_v46  ;;  %v790_v46 = vld [vmem:[#allocation8 + $0x2f8] sm:$0xff] }
  0x8a   :  { %269 = vmatprep.mubr.f32.mxu0 %v2633_v0  ;;  %2162 = vmatprep.subr.mxu1 %v790_v46  ;;  %v762_v46 = vld [vmem:[#allocation8 + $0x218] sm:$0xff] }
  0x8d   :  { %270 = vmatmul.mubr.f32.gmra.mxu0 %v87_v47  ;;  %v729_v47 = vld [vmem:[#allocation8 + $0x110] sm:$0xff] }
  0x8e   :  { %275 = vmatprep.mubr.f32.mxu0 %v2633_v0  ;;  %2109 = vmatpush3.msra.mxu0 %v729_v47  ;;  %v773_v0 = vld [vmem:[#allocation8 + $0x270] sm:$0xff] }
  0x8f   :  { %2110 = vmatprep.subr.mxu0 %v744_v49 }
  0x90   :  { %2111 = vmatpush3.msra.mxu0 %v728_v50 }
  0x91   :  { %276 = vmatmul.mubr.f32.gmra.mxu0 %v88_v48  ;;  %v774_v48 = vld [vmem:[#allocation8 + $0x278] sm:$0xff]  ;;  %2112 = vmatprep.subr.mxu0 %v743_v51 }
  0x92   :  { %2163 = vmatpush3.msra.mxu1 %v774_v48  ;;  %2113 = vmatpush3.msra.mxu0 %v727_v52  ;;  %v777_v48 = vld [vmem:[#allocation8 + $0x290] sm:$0xff] }
  0x93   :  { %2164 = vmatprep.subr.mxu1 %v789_v53  ;;  %2242 = vmatprep.subr.mxu0 %v822_v8 }
  0x94   :  { %2165 = vmatpush3.msra.mxu1 %v773_v0 }
  0x95   :  { %2166 = vmatprep.subr.mxu1 %v788_v54 }
  0x96   :  { %2167 = vmatpush3.msra.mxu1 %v772_v55  ;;  %v761_v55 = vld [vmem:[#allocation8 + $0x210] sm:$0xff] }
  0x97   :  { %2168 = vmatprep.subr.mxu1 %v787_v56 }
  0x98   :  { %2169 = vmatpush3.msra.mxu1 %v771_v57 }
  0x99   :  { %2170 = vmatprep.subr.mxu1 %v786_v58  ;;  %v776_v58 = vld [vmem:[#allocation8 + $0x288] sm:$0xff] }
  0x9a   :  { %2171 = vmatpush3.msra.mxu1 %v770_v59 }
  0x9b   :  { %2172 = vmatprep.subr.mxu1 %v785_v60 }
  0x9c   :  { %2173 = vmatpush3.msra.mxu1 %v769_v62 }
  0x9d   :  { %2174 = vmatprep.subr.mxu1 %v784_v63 }
  0x9e   :  { %2175 = vmatpush3.msra.mxu1 %v768_v3 }
  0x9f   :  { %2176 = vmatprep.subr.mxu1 %v783_v4 }
  0xa0   :  { %2177 = vmatpush3.msra.mxu1 %v767_v7 }
  0xa1   :  { %2178 = vmatprep.subr.mxu1 %v782_v10 }
  0xa2   :  { %2179 = vmatpush3.msra.mxu1 %v766_v12  ;;  %v760_v12 = vld [vmem:[#allocation8 + $0x208] sm:$0xff] }
  0xa3   :  { %2180 = vmatprep.subr.mxu1 %v781_v13 }
  0xa4   :  { %2181 = vmatpush3.msra.mxu1 %v765_v17  ;;  %v775_v17 = vld [vmem:[#allocation8 + $0x280] sm:$0xff] }
  0xa5   :  { %2182 = vmatprep.subr.mxu1 %v780_v21 }
  0xa6   :  { %2183 = vmatpush3.msra.mxu1 %v764_v27 }
  0xa7   :  { %2184 = vmatprep.subr.mxu1 %v779_v31 }
  0xa8   :  { %2185 = vmatpush3.msra.mxu1 %v763_v37  ;;  %v2834_v37 = vld [vmem:[#allocation8 + $0x478] sm:$0xff] }
  0xa9   :  { %2186 = vmatprep.subr.mxu1 %v778_v40 }
  0xaa   :  { %2187 = vmatpush3.msra.mxu1 %v762_v46 }
  0xab   :  { %2188 = vmatprep.subr.mxu1 %v777_v48 }
  0xac   :  { %2189 = vmatpush3.msra.mxu1 %v761_v55 }
  0xad   :  { %2190 = vmatprep.subr.mxu1 %v776_v58 }
  0xae   :  { %2191 = vmatpush3.msra.mxu1 %v760_v12 }
  0xaf   :  { %2192 = vmatprep.subr.mxu1 %v775_v17 }
 0x115   :  { %v2738_v61 = vpop.f32.mrf.mxu0 }
 0x116   :  { %v303_v53 = vmul.f32 %v2738_v61, %v2738_v61 }
 0x117   :  { %v2740_v1 = vpop.f32.mrf.mxu0 }
 0x118   :  { %v416_v18 = vmul.f32 %v2740_v1, %v2740_v1 }
 0x119   :  { %v2742_v2 = vpop.f32.mrf.mxu0 }
 0x11a   :  { %v304_v49 = vmul.f32 %v2742_v2, %v2742_v2  ;;  %v282_v56 = vadd.f32 %v2742_v2, %v2738_v61 }
 0x11b   :  { %v2744_v5 = vpop.f32.mrf.mxu0 }
 0x11c   :  { %v417_v15 = vmul.f32 %v2744_v5, %v2744_v5  ;;  %v395_v19 = vadd.f32 %v2744_v5, %v2740_v1  ;;  %v319_v59 = vadd.f32 %v304_v49, %v303_v53 }
 0x11d   :  { %v2746_v6 = vpop.f32.mrf.mxu0 }
 0x11e   :  { %v432_v23 = vadd.f32 %v417_v15, %v416_v18  ;;  %v305_v0 = vmul.f32 %v2746_v6, %v2746_v6  ;;  %v283_v63 = vadd.f32 %v282_v56, %v2746_v6 }
 0x11f   :  { %v2748_v9 = vpop.f32.mrf.mxu0 }
 0x120   :  { %v418_v20 = vmul.f32 %v2748_v9, %v2748_v9  ;;  %v396_v24 = vadd.f32 %v395_v19, %v2748_v9  ;;  %v320_v7 = vadd.f32 %v319_v59, %v305_v0 }
 0x121   :  { %v2750_v11 = vpop.f32.mrf.mxu0 }
 0x122   :  { %v433_v28 = vadd.f32 %v432_v23, %v418_v20  ;;  %v306_v60 = vmul.f32 %v2750_v11, %v2750_v11  ;;  %v284_v13 = vadd.f32 %v283_v63, %v2750_v11 }
 0x123   :  { %v2752_v14 = vpop.f32.mrf.mxu0 }
 0x124   :  { %v419_v25 = vmul.f32 %v2752_v14, %v2752_v14  ;;  %v397_v29 = vadd.f32 %v396_v24, %v2752_v14  ;;  %v321_v18 = vadd.f32 %v320_v7, %v306_v60 }
 0x125   :  { %v2756_v16 = vpop.f32.mrf.mxu0 }
 0x126   :  { %v434_v33 = vadd.f32 %v433_v28, %v419_v25  ;;  %v307_v8 = vmul.f32 %v2756_v16, %v2756_v16  ;;  %v285_v21 = vadd.f32 %v284_v13, %v2756_v16 }
 0x127   :  { %v2764_v22 = vpop.f32.mrf.mxu0 }
 0x128   :  { %v420_v30 = vmul.f32 %v2764_v22, %v2764_v22  ;;  %v398_v34 = vadd.f32 %v397_v29, %v2764_v22  ;;  %v322_v25 = vadd.f32 %v321_v18, %v307_v8  ;;  %v759_v29 = vld [vmem:[#allocation8 + $0x200] sm:$0xff] }
 0x129   :  { %v2769_v26 = vpop.f32.mrf.mxu0  ;;  %2193 = vmatpush3.msra.mxu1 %v759_v29 }
 0x12a   :  { %v435_v38 = vadd.f32 %v434_v33, %v420_v30  ;;  %v308_v19 = vmul.f32 %v2769_v26, %v2769_v26  ;;  %v286_v30 = vadd.f32 %v285_v21, %v2769_v26  ;;  %2386 = vmatprep.subr.mxu1 %v2834_v37 }
 0x12b   :  { %v2774_v32 = vpop.f32.mrf.mxu0 }
 0x12c   :  { %v421_v35 = vmul.f32 %v2774_v32, %v2774_v32  ;;  %v399_v39 = vadd.f32 %v398_v34, %v2774_v32  ;;  %v323_v33 = vadd.f32 %v322_v25, %v308_v19 }
 0x12d   :  { %v2779_v36 = vpop.f32.mrf.mxu0 }
 0x12e   :  { %v436_v42 = vadd.f32 %v435_v38, %v421_v35  ;;  %v309_v27 = vmul.f32 %v2779_v36, %v2779_v36  ;;  %v287_v38 = vadd.f32 %v286_v30, %v2779_v36 }
 0x12f   :  { %v2782_v41 = vpop.f32.mrf.mxu0 }
 0x130   :  { %v400_v43 = vadd.f32 %v399_v39, %v2782_v41  ;;  %v422_v44 = vmul.f32 %v2782_v41, %v2782_v41 }
 0x131   :  { %v2787_v45 = vpop.f32.mrf.mxu0 }
 0x132   :  { %v437_v47 = vadd.f32 %v436_v42, %v422_v44  ;;  %v310_v34 = vmul.f32 %v2787_v45, %v2787_v45  ;;  %v324_v42 = vadd.f32 %v323_v33, %v309_v27  ;;  %v288_v46 = vadd.f32 %v287_v38, %v2787_v45 }
 0x133   :  { %v2791_v50 = vpop.f32.mrf.mxu0 }
 0x134   :  { %v401_v51 = vadd.f32 %v400_v43, %v2791_v50  ;;  %v423_v52 = vmul.f32 %v2791_v50, %v2791_v50  ;;  %v325_v48 = vadd.f32 %v324_v42, %v310_v34 }
 0x135   :  { %v2800_v54 = vpop.f32.mrf.mxu0 }
 0x136   :  { %v438_v57 = vadd.f32 %v437_v47, %v423_v52  ;;  %v311_v43 = vmul.f32 %v2800_v54, %v2800_v54  ;;  %v289_v52 = vadd.f32 %v288_v46, %v2800_v54 }
 0x137   :  { %v2806_v62 = vpop.f32.mrf.mxu0 }
 0x138   :  { %v402_v3 = vadd.f32 %v401_v51, %v2806_v62  ;;  %v424_v4 = vmul.f32 %v2806_v62, %v2806_v62  ;;  %v326_v55 = vadd.f32 %v325_v48, %v311_v43 }
 0x139   :  { %v2814_v10 = vpop.f32.mrf.mxu0 }
 0x13a   :  { %v439_v15 = vadd.f32 %v438_v57, %v424_v4  ;;  %v312_v49 = vmul.f32 %v2814_v10, %v2814_v10  ;;  %v290_v58 = vadd.f32 %v289_v52, %v2814_v10 }
 0x13b   :  { %v2819_v20 = vpop.f32.mrf.mxu0 }
 0x13c   :  { %v403_v23 = vadd.f32 %v402_v3, %v2819_v20  ;;  %v425_v24 = vmul.f32 %v2819_v20, %v2819_v20  ;;  %v327_v60 = vadd.f32 %v326_v55, %v312_v49 }
 0x13d   :  { %v2827_v28 = vpop.f32.mrf.mxu0 }
 0x13e   :  { %v440_v31 = vadd.f32 %v439_v15, %v425_v24  ;;  %v313_v56 = vmul.f32 %v2827_v28, %v2827_v28  ;;  %v291_v4 = vadd.f32 %v290_v58, %v2827_v28 }
 0x13f   :  { %v2832_v35 = vpop.f32.mrf.mxu0 }
 0x140   :  { %v404_v39 = vadd.f32 %v403_v23, %v2832_v35  ;;  %v426_v40 = vmul.f32 %v2832_v35, %v2832_v35  ;;  %v328_v12 = vadd.f32 %v327_v60, %v313_v56 }
 0x141   :  { %v2843_v44 = vpop.f32.mrf.mxu0 }
 0x142   :  { %v441_v47 = vadd.f32 %v440_v31, %v426_v40  ;;  %v314_v63 = vmul.f32 %v2843_v44, %v2843_v44  ;;  %v292_v15 = vadd.f32 %v291_v4, %v2843_v44 }
 0x143   :  { %v2848_v51 = vpop.f32.mrf.mxu0 }
 0x144   :  { %v405_v53 = vadd.f32 %v404_v39, %v2848_v51  ;;  %v427_v0 = vmul.f32 %v2848_v51, %v2848_v51  ;;  %v329_v19 = vadd.f32 %v328_v12, %v314_v63 }
 0x145   :  { %v2856_v57 = vpop.f32.mrf.mxu0 }
 0x146   :  { %v442_v59 = vadd.f32 %v441_v47, %v427_v0  ;;  %v315_v17 = vmul.f32 %v2856_v57, %v2856_v57  ;;  %v293_v23 = vadd.f32 %v292_v15, %v2856_v57 }
 0x147   :  { %v2861_v3 = vpop.f32.mrf.mxu0 }
 0x148   :  { %v406_v7 = vadd.f32 %v405_v53, %v2861_v3  ;;  %v428_v8 = vmul.f32 %v2861_v3, %v2861_v3  ;;  %v330_v30 = vadd.f32 %v329_v19, %v315_v17 }
 0x149   :  { %v2867_v13 = vpop.f32.mrf.mxu0 }
 0x14a   :  { %v443_v18 = vadd.f32 %v442_v59, %v428_v8  ;;  %v316_v24 = vmul.f32 %v2867_v13, %v2867_v13  ;;  %v294_v31 = vadd.f32 %v293_v23, %v2867_v13 }
 0x14b   :  { %v2872_v21 = vpop.f32.mrf.mxu0 }
 0x14c   :  { %v407_v25 = vadd.f32 %v406_v7, %v2872_v21  ;;  %v429_v27 = vmul.f32 %v2872_v21, %v2872_v21  ;;  %v331_v39 = vadd.f32 %v330_v30, %v316_v24 }
 0x14d   :  { %v2880_v29 = vpop.f32.mrf.mxu0 }
 0x14e   :  { %v444_v33 = vadd.f32 %v443_v18, %v429_v27  ;;  %v317_v34 = vmul.f32 %v2880_v29, %v2880_v29  ;;  %v295_v40 = vadd.f32 %v294_v31, %v2880_v29 }
 0x14f   :  { %v2885_v38 = vpop.f32.mrf.mxu0 }
 0x150   :  { %v408_v42 = vadd.f32 %v407_v25, %v2885_v38  ;;  %v430_v43 = vmul.f32 %v2885_v38, %v2885_v38  ;;  %v332_v47 = vadd.f32 %v331_v39, %v317_v34 }
 0x151   :  { %v2891_v46 = vpop.f32.mrf.mxu0 }
 0x152   :  { %v445_v48 = vadd.f32 %v444_v33, %v430_v43  ;;  %v296_v49 = vadd.f32 %v295_v40, %v2891_v46  ;;  %v318_v52 = vmul.f32 %v2891_v46, %v2891_v46 }
 0x153   :  { %v2896_v53 = vpop.f32.mrf.mxu0 }
 0x154   :  { %v297_v0 = vrot.slane %v296_v49, 4  ;;  %v333_v55 = vadd.f32 %v332_v47, %v318_v52  ;;  %v409_v56 = vadd.f32 %v408_v42, %v2896_v53  ;;  %v431_v58 = vmul.f32 %v2896_v53, %v2896_v53 }
 0x156   :  { %v298_v59 = vadd.f32 %v297_v0, %v296_v49  ;;  %v334_v60 = vrot.slane %v333_v55, 4  ;;  %v410_v63 = vrot.slane %v409_v56, 4  ;;  %v446_v4 = vadd.f32 %v445_v48, %v431_v58 }
 0x158   :  { %v299_v7 = vrot.slane %v298_v59, 2  ;;  %v335_v8 = vadd.f32 %v334_v60, %v333_v55  ;;  %v411_v12 = vadd.f32 %v410_v63, %v409_v56  ;;  %v447_v15 = vrot.slane %v446_v4, 4 }
 0x15a   :  { %v300_v17 = vadd.f32 %v299_v7, %v298_v59  ;;  %v336_v18 = vrot.slane %v335_v8, 2  ;;  %v412_v19 = vrot.slane %v411_v12, 2  ;;  %v448_v23 = vadd.f32 %v447_v15, %v446_v4 }
 0x15c   :  { %v301_v24 = vrot.slane %v300_v17, 1  ;;  %v337_v25 = vadd.f32 %v336_v18, %v335_v8  ;;  %v413_v27 = vadd.f32 %v412_v19, %v411_v12  ;;  %v449_v30 = vrot.slane %v448_v23, 2 }
 0x15e   :  { %v302_v31 = vadd.f32 %v301_v24, %v300_v17  ;;  %v338_v33 = vrot.slane %v337_v25, 1  ;;  %v414_v34 = vrot.slane %v413_v27, 1  ;;  %v450_v39 = vadd.f32 %v449_v30, %v448_v23 }
 0x160   :  { %v339_v40 = vadd.f32 %v338_v33, %v337_v25  ;;  %v2901_v42 = vmul.f32 0.0078125, %v302_v31  ;;  %v415_v43 = vadd.f32 %v414_v34, %v413_v27  ;;  %v451_v47 = vrot.slane %v450_v39, 1 }
 0x162   :  { %v341_v48 = vmul.f32 0.0078125, %v339_v40  ;;  %v342_v49 = vmul.f32 %v2901_v42, %v2901_v42  ;;  %v452_v52 = vadd.f32 %v451_v47, %v450_v39  ;;  %v2905_v0 = vmul.f32 0.0078125, %v415_v43 }
 0x163   :  { %v360_v30 = vsub.f32 %v2891_v46, %v2901_v42  ;;  %v345_v31 = vsub.f32 %v2738_v61, %v2901_v42  ;;  %v346_v33 = vsub.f32 %v2742_v2, %v2901_v42  ;;  %v347_v34 = vsub.f32 %v2746_v6, %v2901_v42 }
 0x164   :  { %v343_v55 = vsub.f32 %v341_v48, %v342_v49  ;;  %v454_v56 = vmul.f32 0.0078125, %v452_v52  ;;  %v455_v58 = vmul.f32 %v2905_v0, %v2905_v0  ;;  %v472_v4 = vsub.f32 %v2885_v38, %v2905_v0 }
 0x165   :  { %v463_v8 = vsub.f32 %v2774_v32, %v2905_v0  ;;  %v464_v15 = vsub.f32 %v2782_v41, %v2905_v0  ;;  %v465_v17 = vsub.f32 %v2791_v50, %v2905_v0  ;;  %v466_v18 = vsub.f32 %v2806_v62, %v2905_v0 }
 0x166   :  { %v344_v59 = vmax.f32 %v343_v55, 0.0  ;;  %v456_v60 = vsub.f32 %v454_v56, %v455_v58  ;;  %v467_v19 = vsub.f32 %v2819_v20, %v2905_v0  ;;  %v468_v23 = vsub.f32 %v2832_v35, %v2905_v0  ;;  %v821_v35 = vld [vmem:[#allocation8 + $0x3f0] sm:$0xff] }
 0x167   :  { %v469_v24 = vsub.f32 %v2848_v51, %v2905_v0  ;;  %v470_v25 = vsub.f32 %v2861_v3, %v2905_v0  ;;  %v471_v27 = vsub.f32 %v2872_v21, %v2905_v0  ;;  %v348_v39 = vsub.f32 %v2750_v11, %v2901_v42  ;;  %v805_v51 = vld [vmem:[#allocation8 + $0x370] sm:$0xff]  ;;  %v820_v3 = vld [vmem:[#allocation8 + $0x3e8] sm:$0xff] }
 0x168   :  { %v361_v63 = vadd.f32 1e-05, %v344_v59  ;;  %v457_v7 = vmax.f32 %v456_v60, 0.0  ;;  %v349_v40 = vsub.f32 %v2756_v16, %v2901_v42  ;;  %v473_v43 = vsub.f32 %v2896_v53, %v2905_v0  ;;  %v804_v21 = vld [vmem:[#allocation8 + $0x368] sm:$0xff] }
 0x169   :  { %v350_v46 = vsub.f32 %v2769_v26, %v2901_v42  ;;  %v351_v61 = vsub.f32 %v2779_v36, %v2901_v42  ;;  %v352_v2 = vsub.f32 %v2787_v45, %v2901_v42  ;;  %v353_v6 = vsub.f32 %v2800_v54, %v2901_v42 }
 0x16a   :  { %2508 = vrsqrt.f32 %v361_v63  ;;  %v474_v12 = vadd.f32 1e-05, %v457_v7  ;;  %v354_v11 = vsub.f32 %v2814_v10, %v2901_v42  ;;  %v355_v16 = vsub.f32 %v2827_v28, %v2901_v42 }
 0x16b   :  { %v356_v53 = vsub.f32 %v2843_v44, %v2901_v42  ;;  %v357_v26 = vsub.f32 %v2856_v57, %v2901_v42  ;;  %v358_v36 = vsub.f32 %v2867_v13, %v2901_v42  ;;  %v359_v45 = vsub.f32 %v2880_v29, %v2901_v42 }
 0x16c   :  { %2510 = vrsqrt.f32 %v474_v12  ;;  %v458_v54 = vsub.f32 %v2740_v1, %v2905_v0  ;;  %v459_v10 = vsub.f32 %v2744_v5, %v2905_v0  ;;  %v460_v28 = vsub.f32 %v2748_v9, %v2905_v0 }
 0x16d   :  { %v461_v44 = vsub.f32 %v2752_v14, %v2905_v0  ;;  %v462_v57 = vsub.f32 %v2764_v22, %v2905_v0 }
 0x177   :  { %v2509_v47 = vpop.eup %2508 }
 0x178   :  { %v378_v13 = vmul.f32 %v2509_v47, %v360_v30  ;;  %v363_v48 = vmul.f32 %v2509_v47, %v345_v31  ;;  %v364_v49 = vmul.f32 %v2509_v47, %v346_v33  ;;  %v365_v29 = vmul.f32 %v2509_v47, %v347_v34 }
 0x179   :  { %v366_v42 = vmul.f32 %v2509_v47, %v348_v39  ;;  %v367_v52 = vmul.f32 %v2509_v47, %v349_v40  ;;  %v368_v1 = vmul.f32 %v2509_v47, %v350_v46  ;;  %v369_v55 = vmul.f32 %v2509_v47, %v351_v61  ;;  %v2511_v56 = vpop.eup %2510 }
 0x17a   :  { %v394_v58 = vmax.f32 %v378_v13, 0.0  ;;  %v2973_v5 = vmax.f32 %v363_v48, 0.0  ;;  %v2975_v59 = vmax.f32 %v364_v49, 0.0  ;;  %v2977_v9 = vmax.f32 %v365_v29, 0.0 }
 0x17b   :  { %v2979_v14 = vmul.f32 %v2511_v56, %v473_v43  ;;  %v2981_v60 = vmax.f32 %v366_v42, 0.0  ;;  %v2983_v22 = vmax.f32 %v367_v52, 0.0  ;;  %v2985_v63 = vmax.f32 %v368_v1, 0.0  ;;  %v801_v42 = vld [vmem:[#allocation8 + $0x350] sm:$0xff]  ;;  %v816_v1 = vld [vmem:[#allocation8 + $0x3c8] sm:$0xff] }
 0x17c   :  { %549 = vst [vmem:[#allocation2 + $0x121] sm:$0xff] %v394_v58  ;;  %534 = vst [vmem:[#allocation2 + $0x11] sm:$0xff] %v2973_v5  ;;  %908 = vmatprep.mubr.f32.mxu1 %v2973_v5  ;;  %v2991_v7 = vmax.f32 %v369_v55, 0.0  ;;  %v370_v12 = vmul.f32 %v2509_v47, %v352_v2  ;;  %v371_v30 = vmul.f32 %v2509_v47, %v353_v6  ;;  %v800_v55 = vld [vmem:[#allocation8 + $0x348] sm:$0xff]  ;;  %v815_v58 = vld [vmem:[#allocation8 + $0x3c0] sm:$0xff] }
 0x17d   :  { %3700 = vst [vmem:[#allocation16_spill] sm:$0xff] %v2979_v14  ;;  %535 = vst [vmem:[#allocation2 + $0x21] sm:$0xff] %v2975_v59  ;;  %v372_v31 = vmul.f32 %v2509_v47, %v354_v11  ;;  %v373_v33 = vmul.f32 %v2509_v47, %v355_v16  ;;  %v374_v34 = vmul.f32 %v2509_v47, %v356_v53 }
 0x17e   :  { %536 = vst [vmem:[#allocation2 + $0x31] sm:$0xff] %v2977_v9  ;;  %537 = vst [vmem:[#allocation2 + $0x41] sm:$0xff] %v2981_v60  ;;  %v375_v39 = vmul.f32 %v2509_v47, %v357_v26  ;;  %v376_v40 = vmul.f32 %v2509_v47, %v358_v36  ;;  %v2997_v43 = vmax.f32 %v370_v12, 0.0  ;;  %v2999_v46 = vmax.f32 %v371_v30, 0.0  ;;  %v799_v30 = vld [vmem:[#allocation8 + $0x340] sm:$0xff] }
 0x17f   :  { %538 = vst [vmem:[#allocation2 + $0x51] sm:$0xff] %v2983_v22  ;;  %539 = vst [vmem:[#allocation2 + $0x61] sm:$0xff] %v2985_v63  ;;  %v3001_v61 = vmax.f32 %v372_v31, 0.0  ;;  %v377_v2 = vmul.f32 %v2509_v47, %v359_v45  ;;  %v3003_v6 = vmax.f32 %v373_v33, 0.0  ;;  %v3005_v11 = vmax.f32 %v374_v34, 0.0  ;;  %v814_v31 = vld [vmem:[#allocation8 + $0x3b8] sm:$0xff] }
 0x180   :  { %540 = vst [vmem:[#allocation2 + $0x71] sm:$0xff] %v2991_v7  ;;  %v3007_v13 = vmax.f32 %v375_v39, 0.0  ;;  %v3009_v48 = vmax.f32 %v376_v40, 0.0  ;;  %541 = vst [vmem:[#allocation2 + $0x81] sm:$0xff] %v2997_v43  ;;  %v3019_v53 = vmul.f32 %v2511_v56, %v472_v4  ;;  %v3021_v26 = vmul.f32 %v2511_v56, %v458_v54  ;;  %v582_v4 = vld [vmem:[#allocation2 + $0x2] sm:$0xff]  ;;  %v798_v34 = vld [vmem:[#allocation8 + $0x338] sm:$0xff] }
 0x181   :  { %542 = vst [vmem:[#allocation2 + $0xb1] sm:$0xff] %v2999_v46  ;;  %543 = vst [vmem:[#allocation2 + $0xc1] sm:$0xff] %v3001_v61  ;;  %v3014_v16 = vmax.f32 %v377_v2, 0.0  ;;  %v3023_v36 = vmul.f32 %v2511_v56, %v459_v10  ;;  %v3029_v45 = vmul.f32 %v2511_v56, %v460_v28  ;;  %v3031_v47 = vmul.f32 %v2511_v56, %v461_v44  ;;  %v806_v44 = vld [vmem:[#allocation8 + $0x378] sm:$0xff]  ;;  %v813_v40 = vld [vmem:[#allocation8 + $0x3b0] sm:$0xff] }
 0x182   :  { %3701 = vst [vmem:[#allocation17_spill] sm:$0xff] %v3019_v53  ;;  %3702 = vst [vmem:[#allocation18_spill] sm:$0xff] %v3021_v26  ;;  %v3033_v49 = vmul.f32 %v2511_v56, %v462_v57  ;;  %v3038_v38 = vmul.f32 %v2511_v56, %v463_v8  ;;  %v3044_v54 = vmul.f32 %v2511_v56, %v464_v15  ;;  %v817_v57 = vld [vmem:[#allocation8 + $0x3d0] sm:$0xff]  ;;  %v574_v2 = vld [vmem:[#allocation2 + $0xa1] sm:$0xff] }
 0x183   :  { %3703 = vst [vmem:[#allocation19_spill] sm:$0xff] %v3023_v36  ;;  %544 = vst [vmem:[#allocation2 + $0xd1] sm:$0xff] %v3003_v6  ;;  %v3049_v10 = vmul.f32 %v2511_v56, %v465_v17  ;;  %v3054_v28 = vmul.f32 %v2511_v56, %v466_v18  ;;  %v3059_v32 = vmul.f32 %v2511_v56, %v467_v19  ;;  %v598_v8 = vld [vmem:[#allocation2 + $0x10] sm:$0xff]  ;;  %v819_v18 = vld [vmem:[#allocation8 + $0x3e0] sm:$0xff] }
 0x184   :  { %545 = vst [vmem:[#allocation2 + $0xe1] sm:$0xff] %v3005_v11  ;;  %546 = vst [vmem:[#allocation2 + $0xf1] sm:$0xff] %v3007_v13  ;;  %v3064_v41 = vmul.f32 %v2511_v56, %v468_v23  ;;  %v3069_v50 = vmul.f32 %v2511_v56, %v469_v24  ;;  %v3074_v62 = vmul.f32 %v2511_v56, %v470_v25  ;;  %1048 = vmatprep.mubr.f32.mxu0 %v598_v8  ;;  %v3082_v15 = vld [vmem:[#allocation2 + $0x20] sm:$0xff]  ;;  %v3086_v17 = vld [vmem:[#allocation2 + $0x12] sm:$0xff] }
 0x185   :  { %547 = vst [vmem:[#allocation2 + $0x101] sm:$0xff] %v3009_v48  ;;  %3704 = vst [vmem:[#allocation20_spill] sm:$0xff] %v3029_v45  ;;  %v3079_v20 = vmul.f32 %v2511_v56, %v471_v27  ;;  %909 = vmatmul.mubr.f32.gmra.mxu1 %v598_v8  ;;  %1049 = vmatmul.mubr.f32.vlgmr.msra.gmra.mxu0 %v582_v4  ;;  %v3090_v0 = vld [vmem:[#allocation2 + $0x30] sm:$0xff]  ;;  %v803_v19 = vld [vmem:[#allocation8 + $0x360] sm:$0xff] }
 0x186   :  { %3705 = vst [vmem:[#allocation21_spill] sm:$0xff] %v3031_v47  ;;  %3706 = vst [vmem:[#allocation22_spill] sm:$0xff] %v3033_v49  ;;  %913 = vmatprep.mubr.f32.mxu1 %v2975_v59  ;;  %1053 = vmatprep.mubr.f32.mxu0 %v3082_v15  ;;  %v3094_v23 = vld [vmem:[#allocation2 + $0x22] sm:$0xff]  ;;  %v818_v24 = vld [vmem:[#allocation8 + $0x3d8] sm:$0xff] }
 0x187   :  { %3707 = vst [vmem:[#allocation23_spill] sm:$0xff] %v3038_v38  ;;  %548 = vst [vmem:[#allocation2 + $0x111] sm:$0xff] %v3014_v16  ;;  %2243 = vmatpush3.msra.mxu0 %v806_v44  ;;  %v3098_v25 = vld [vmem:[#allocation2 + $0x40] sm:$0xff]  ;;  %v802_v27 = vld [vmem:[#allocation8 + $0x358] sm:$0xff] }
 0x188   :  { %3708 = vst [vmem:[#allocation24_spill] sm:$0xff] %v3044_v54  ;;  %3709 = vst [vmem:[#allocation25_spill] sm:$0xff] %v3049_v10  ;;  %2244 = vmatprep.subr.mxu0 %v821_v35  ;;  %v3102_v29 = vld [vmem:[#allocation2 + $0x32] sm:$0xff]  ;;  %v3110_v56 = vld [vmem:[#allocation2 + $0x42] sm:$0xff] }
 0x189   :  { %3710 = vst [vmem:[#allocation26_spill] sm:$0xff] %v3054_v28  ;;  %3711 = vst [vmem:[#allocation27_spill] sm:$0xff] %v3059_v32  ;;  %914 = vmatmul.mubr.f32.gmra.mxu1 %v3082_v15  ;;  %2245 = vmatpush3.msra.mxu0 %v805_v51  ;;  %v3106_v52 = vld [vmem:[#allocation2 + $0x50] sm:$0xff]  ;;  %v3114_v12 = vld [vmem:[#allocation2 + $0x60] sm:$0xff] }
 0x18a   :  { %3712 = vst [vmem:[#allocation28_spill] sm:$0xff] %v3064_v41  ;;  %3713 = vst [vmem:[#allocation29_spill] sm:$0xff] %v3069_v50  ;;  %1054 = vmatmul.mubr.f32.gmra.mxu0 %v3086_v17  ;;  %918 = vmatprep.mubr.f32.mxu1 %v2977_v9  ;;  %v3118_v33 = vld [vmem:[#allocation2 + $0x52] sm:$0xff]  ;;  %v3126_v8 = vld [vmem:[#allocation2 + $0x62] sm:$0xff] }
 0x18b   :  { %3714 = vst [vmem:[#allocation30_spill] sm:$0xff] %v3074_v62  ;;  %3715 = vst [vmem:[#allocation31_spill] sm:$0xff] %v3079_v20  ;;  %1058 = vmatprep.mubr.f32.mxu0 %v3090_v0  ;;  %2246 = vmatprep.subr.mxu0 %v820_v3  ;;  %v3122_v39 = vld [vmem:[#allocation2 + $0x70] sm:$0xff]  ;;  %v812_v44 = vld [vmem:[#allocation8 + $0x3a8] sm:$0xff] }
 0x18c   :  { %2247 = vmatpush3.msra.mxu0 %v804_v21  ;;  %v797_v4 = vld [vmem:[#allocation8 + $0x330] sm:$0xff]  ;;  %v3129_v35 = vld [vmem:[#allocation2 + $0x80] sm:$0xff]  ;;  %v796_v51 = vld [vmem:[#allocation8 + $0x328] sm:$0xff] }
 0x18d   :  { %919 = vmatmul.mubr.f32.gmra.mxu1 %v3090_v0  ;;  %2248 = vmatprep.subr.mxu0 %v819_v18  ;;  %v811_v3 = vld [vmem:[#allocation8 + $0x3a0] sm:$0xff]  ;;  %v3135_v18 = vld [vmem:[#allocation2 + $0x72] sm:$0xff] }
 0x18e   :  { %1059 = vmatmul.mubr.f32.gmra.mxu0 %v3094_v23  ;;  %923 = vmatprep.mubr.f32.mxu1 %v2981_v60  ;;  %v3132_v21 = vld [vmem:[#allocation2] sm:$0xff] }
 0x18f   :  { %1063 = vmatprep.mubr.f32.mxu0 %v3098_v25  ;;  %2249 = vmatpush3.msra.mxu0 %v803_v19  ;;  %v795_v19 = vld [vmem:[#allocation8 + $0x320] sm:$0xff] }
 0x190   :  { %2250 = vmatprep.subr.mxu0 %v818_v24  ;;  %v606_v24 = vld [vmem:[#allocation2 + $0xb0] sm:$0xff] }
 0x191   :  { %924 = vmatmul.mubr.f32.gmra.mxu1 %v3098_v25  ;;  %2251 = vmatpush3.msra.mxu0 %v802_v27  ;;  %v810_v27 = vld [vmem:[#allocation8 + $0x398] sm:$0xff] }
 0x192   :  { %1064 = vmatmul.mubr.f32.gmra.mxu0 %v3102_v29  ;;  %928 = vmatprep.mubr.f32.mxu1 %v2983_v22 }
 0x193   :  { %1068 = vmatprep.mubr.f32.mxu0 %v3106_v52  ;;  %2252 = vmatprep.subr.mxu0 %v817_v57  ;;  %v590_v57 = vld [vmem:[#allocation2 + $0xa2] sm:$0xff] }
 0x194   :  { %2253 = vmatpush3.msra.mxu0 %v801_v42  ;;  %v794_v42 = vld [vmem:[#allocation8 + $0x318] sm:$0xff] }
 0x195   :  { %929 = vmatmul.mubr.f32.gmra.mxu1 %v3106_v52  ;;  %2254 = vmatprep.subr.mxu0 %v816_v1  ;;  %v809_v1 = vld [vmem:[#allocation8 + $0x390] sm:$0xff] }
 0x196   :  { %1069 = vmatmul.mubr.f32.gmra.mxu0 %v3110_v56  ;;  %933 = vmatprep.mubr.f32.mxu1 %v2985_v63 }
 0x197   :  { %1073 = vmatprep.mubr.f32.mxu0 %v3114_v12  ;;  %2255 = vmatpush3.msra.mxu0 %v800_v55  ;;  %v3140_v55 = vld [vmem:[#allocation2 + $0xc0] sm:$0xff] }
 0x198   :  { %2256 = vmatprep.subr.mxu0 %v815_v58  ;;  %v793_v58 = vld [vmem:[#allocation8 + $0x310] sm:$0xff] }
 0x199   :  { %934 = vmatmul.mubr.f32.gmra.mxu1 %v3114_v12  ;;  %2257 = vmatpush3.msra.mxu0 %v799_v30  ;;  %v808_v30 = vld [vmem:[#allocation8 + $0x388] sm:$0xff] }
 0x19a   :  { %1074 = vmatmul.mubr.f32.gmra.mxu0 %v3118_v33  ;;  %938 = vmatprep.mubr.f32.mxu1 %v2991_v7 }
 0x19b   :  { %1078 = vmatprep.mubr.f32.mxu0 %v3122_v39  ;;  %2258 = vmatprep.subr.mxu0 %v814_v31  ;;  %v3144_v31 = vld [vmem:[#allocation2 + $0xb2] sm:$0xff] }
 0x19c   :  { %2259 = vmatpush3.msra.mxu0 %v798_v34  ;;  %v792_v34 = vld [vmem:[#allocation8 + $0x308] sm:$0xff] }
 0x19d   :  { %939 = vmatmul.mubr.f32.gmra.mxu1 %v3122_v39  ;;  %2260 = vmatprep.subr.mxu0 %v813_v40  ;;  %v3148_v40 = vld [vmem:[#allocation2 + $0xd0] sm:$0xff] }
 0x19e   :  { %1079 = vmatmul.mubr.f32.gmra.mxu0 %v3126_v8  ;;  %943 = vmatprep.mubr.f32.mxu1 %v574_v2  ;;  %v807_v2 = vld [vmem:[#allocation8 + $0x380] sm:$0xff] }
 0x19f   :  { %1083 = vmatprep.mubr.f32.mxu0 %v3129_v35  ;;  %2261 = vmatpush3.msra.mxu0 %v797_v4  ;;  %v791_v4 = vld [vmem:[#allocation8 + $0x300] sm:$0xff] }
 0x1a0   :  { %2262 = vmatprep.subr.mxu0 %v812_v44  ;;  %v3152_v44 = vld [vmem:[#allocation2 + $0xc2] sm:$0xff] }
 0x1a1   :  { %944 = vmatmul.mubr.f32.gmra.mxu1 %v3132_v21  ;;  %2263 = vmatpush3.msra.mxu0 %v796_v51  ;;  %v3156_v51 = vld [vmem:[#allocation2 + $0xe0] sm:$0xff] }
 0x1a2   :  { %1084 = vmatmul.mubr.f32.gmra.mxu0 %v3135_v18  ;;  %948 = vmatprep.mubr.f32.mxu1 %v2999_v46 }
 0x1a3   :  { %1088 = vmatprep.mubr.f32.mxu0 %v606_v24  ;;  %2264 = vmatprep.subr.mxu0 %v811_v3  ;;  %v3160_v3 = vld [vmem:[#allocation2 + $0xd2] sm:$0xff] }
 0x1a4   :  { %2265 = vmatpush3.msra.mxu0 %v795_v19  ;;  %v3164_v19 = vld [vmem:[#allocation2 + $0xf0] sm:$0xff] }
 0x1a5   :  { %949 = vmatmul.mubr.f32.gmra.mxu1 %v606_v24  ;;  %2266 = vmatprep.subr.mxu0 %v810_v27  ;;  %v3168_v24 = vld [vmem:[#allocation2 + $0xe2] sm:$0xff] }
 0x1a6   :  { %1089 = vmatmul.mubr.f32.gmra.mxu0 %v590_v57  ;;  %953 = vmatprep.mubr.f32.mxu1 %v3001_v61  ;;  %v3172_v27 = vld [vmem:[#allocation2 + $0x100] sm:$0xff]  ;;  %v3176_v57 = vld [vmem:[#allocation2 + $0xf2] sm:$0xff] }
 0x1a7   :  { %1093 = vmatprep.mubr.f32.mxu0 %v3140_v55  ;;  %2267 = vmatpush3.msra.mxu0 %v794_v42  ;;  %v3180_v42 = vld [vmem:[#allocation2 + $0x110] sm:$0xff] }
 0x1a8   :  { %2268 = vmatprep.subr.mxu0 %v809_v1  ;;  %v3184_v1 = vld [vmem:[#allocation2 + $0x102] sm:$0xff] }
 0x1a9   :  { %954 = vmatmul.mubr.f32.gmra.mxu1 %v3140_v55  ;;  %2269 = vmatpush3.msra.mxu0 %v793_v58  ;;  %v3187_v58 = vld [vmem:[#allocation2 + $0x120] sm:$0xff] }
 0x1aa   :  { %1094 = vmatmul.mubr.f32.gmra.mxu0 %v3144_v31  ;;  %958 = vmatprep.mubr.f32.mxu1 %v3003_v6 }
 0x1ab   :  { %1098 = vmatprep.mubr.f32.mxu0 %v3148_v40  ;;  %2270 = vmatprep.subr.mxu0 %v808_v30  ;;  %v3191_v30 = vld [vmem:[#allocation2 + $0x112] sm:$0xff] }
 0x1ac   :  { %2271 = vmatpush3.msra.mxu0 %v792_v34  ;;  %v837_v34 = vld [vmem:[#allocation8 + $0x470] sm:$0xff] }
 0x1ad   :  { %959 = vmatmul.mubr.f32.gmra.mxu1 %v3148_v40  ;;  %2272 = vmatprep.subr.mxu0 %v807_v2  ;;  %v836_v2 = vld [vmem:[#allocation8 + $0x468] sm:$0xff] }
 0x1ae   :  { %1099 = vmatmul.mubr.f32.gmra.mxu0 %v3152_v44  ;;  %963 = vmatprep.mubr.f32.mxu1 %v3005_v11 }
 0x1af   :  { %1103 = vmatprep.mubr.f32.mxu0 %v3156_v51  ;;  %2273 = vmatpush3.msra.mxu0 %v791_v4 }
 0x1b1   :  { %964 = vmatmul.mubr.f32.gmra.mxu1 %v3156_v51 }
 0x1b2   :  { %1104 = vmatmul.mubr.f32.gmra.mxu0 %v3160_v3  ;;  %968 = vmatprep.mubr.f32.mxu1 %v3007_v13 }
 0x1b3   :  { %1108 = vmatprep.mubr.f32.mxu0 %v3164_v19 }
 0x1b5   :  { %969 = vmatmul.mubr.f32.gmra.mxu1 %v3164_v19 }
 0x1b6   :  { %1109 = vmatmul.mubr.f32.gmra.mxu0 %v3168_v24  ;;  %973 = vmatprep.mubr.f32.mxu1 %v3009_v48 }
 0x1b7   :  { %1113 = vmatprep.mubr.f32.mxu0 %v3172_v27 }
 0x1b9   :  { %974 = vmatmul.mubr.f32.gmra.mxu1 %v3172_v27 }
 0x1ba   :  { %1114 = vmatmul.mubr.f32.gmra.mxu0 %v3176_v57  ;;  %978 = vmatprep.mubr.f32.mxu1 %v3014_v16 }
 0x1bb   :  { %1118 = vmatprep.mubr.f32.mxu0 %v3180_v42 }
 0x1bd   :  { %979 = vmatmul.mubr.f32.gmra.mxu1 %v3180_v42 }
 0x1be   :  { %1119 = vmatmul.mubr.f32.gmra.mxu0 %v3184_v1  ;;  %1193 = vmatprep.mubr.f32.mxu1 %v3086_v17  ;;  %v645_v17 = vld [vmem:[#allocation2 + $0x122] sm:$0xff] }
 0x1bf   :  { %1123 = vmatprep.mubr.f32.mxu0 %v3187_v58 }
 0x1c1   :  { %1194 = vmatmul.mubr.f32.vlgmr.msra.gmra.mxu1 %v2973_v5  ;;  %v835_v5 = vld [vmem:[#allocation8 + $0x460] sm:$0xff] }
 0x1c2   :  { %1124 = vmatmul.mubr.f32.gmra.mxu0 %v3191_v30  ;;  %2387 = vmatpush3.msra.mxu1 %v2834_v37  ;;  %v834_v37 = vld [vmem:[#allocation8 + $0x458] sm:$0xff] }
 0x1c3   :  { %1198 = vmatprep.mubr.f32.mxu1 %v3094_v23  ;;  %1338 = vmatprep.mubr.f32.mxu0 %v2975_v59 }
 0x1c4   :  { %2388 = vmatprep.subr.mxu1 %v837_v34 }
 0x1c5   :  { %1199 = vmatmul.mubr.f32.gmra.mxu1 %v2975_v59  ;;  %v833_v59 = vld [vmem:[#allocation8 + $0x450] sm:$0xff] }
 0x1c6   :  { %1339 = vmatmul.mubr.f32.vlgmr.msra.gmra.mxu0 %v3082_v15  ;;  %2389 = vmatpush3.msra.mxu1 %v837_v34  ;;  %v830_v15 = vld [vmem:[#allocation8 + $0x438] sm:$0xff] }
 0x1c7   :  { %1203 = vmatprep.mubr.f32.mxu1 %v3102_v29  ;;  %1343 = vmatprep.mubr.f32.mxu0 %v2977_v9 }
 0x1c8   :  { %2390 = vmatprep.subr.mxu1 %v836_v2 }
 0x1c9   :  { %1204 = vmatmul.mubr.f32.gmra.mxu1 %v2977_v9  ;;  %v832_v9 = vld [vmem:[#allocation8 + $0x448] sm:$0xff] }
 0x1ca   :  { %1344 = vmatmul.mubr.f32.gmra.mxu0 %v3090_v0  ;;  %2391 = vmatpush3.msra.mxu1 %v836_v2  ;;  %v677_v0 = vld [vmem:[#allocation2 + $0x121] sm:$0xff] }
 0x1cb   :  { %1208 = vmatprep.mubr.f32.mxu1 %v3110_v56  ;;  %1348 = vmatprep.mubr.f32.mxu0 %v2981_v60 }
 0x1cc   :  { %2392 = vmatprep.subr.mxu1 %v835_v5 }
 0x1cd   :  { %1209 = vmatmul.mubr.f32.gmra.mxu1 %v2981_v60  ;;  %v831_v60 = vld [vmem:[#allocation8 + $0x440] sm:$0xff] }
 0x1ce   :  { %1349 = vmatmul.mubr.f32.gmra.mxu0 %v3098_v25  ;;  %2393 = vmatpush3.msra.mxu1 %v835_v5  ;;  %v2034_v25 = vpop.f32.mrf.mxu1 }
 0x1cf   :  { %1213 = vmatprep.mubr.f32.mxu1 %v3118_v33  ;;  %1353 = vmatprep.mubr.f32.mxu0 %v2983_v22 }
 0x1d0   :  { %2394 = vmatprep.subr.mxu1 %v834_v37 }
 0x1d1   :  { %1214 = vmatmul.mubr.f32.gmra.mxu1 %v2983_v22  ;;  %v3220_v22 = vld [vmem:[#allocation2 + $0x82] sm:$0xff] }
 0x1d2   :  { %1354 = vmatmul.mubr.f32.gmra.mxu0 %v3106_v52  ;;  %2395 = vmatpush3.msra.mxu1 %v834_v37 }
 0x1d3   :  { %1218 = vmatprep.mubr.f32.mxu1 %v3126_v8  ;;  %1358 = vmatprep.mubr.f32.mxu0 %v2985_v63 }
 0x1d4   :  { %2396 = vmatprep.subr.mxu1 %v833_v59 }
 0x1d5   :  { %1219 = vmatmul.mubr.f32.gmra.mxu1 %v2985_v63  ;;  %v670_v63 = vld [vmem:[#allocation2 + $0x91] sm:$0xff] }
 0x1d6   :  { %1359 = vmatmul.mubr.f32.gmra.mxu0 %v3114_v12  ;;  %2397 = vmatpush3.msra.mxu1 %v833_v59 }
 0x1d7   :  { %1223 = vmatprep.mubr.f32.mxu1 %v3135_v18  ;;  %1363 = vmatprep.mubr.f32.mxu0 %v2991_v7 }
 0x1d8   :  { %2398 = vmatprep.subr.mxu1 %v832_v9 }
 0x1d9   :  { %1224 = vmatmul.mubr.f32.gmra.mxu1 %v2991_v7  ;;  %v829_v7 = vld [vmem:[#allocation8 + $0x430] sm:$0xff] }
 0x1da   :  { %1364 = vmatmul.mubr.f32.gmra.mxu0 %v3122_v39  ;;  %2399 = vmatpush3.msra.mxu1 %v832_v9 }
 0x1db   :  { %1228 = vmatprep.mubr.f32.mxu1 %v3220_v22  ;;  %1368 = vmatprep.mubr.f32.mxu0 %v2997_v43 }
 0x1dc   :  { %2400 = vmatprep.subr.mxu1 %v831_v60 }
 0x1dd   :  { %1229 = vmatmul.mubr.f32.gmra.mxu1 %v2997_v43  ;;  %v828_v43 = vld [vmem:[#allocation8 + $0x428] sm:$0xff] }
 0x1de   :  { %1369 = vmatmul.mubr.f32.gmra.mxu0 %v3129_v35  ;;  %2401 = vmatpush3.msra.mxu1 %v831_v60 }
 0x1df   :  { %1233 = vmatprep.mubr.f32.mxu1 %v3144_v31  ;;  %1373 = vmatprep.mubr.f32.mxu0 %v670_v63 }
 0x1e0   :  { %2402 = vmatprep.subr.mxu1 %v830_v15 }
 0x1e1   :  { %1234 = vmatmul.mubr.f32.gmra.mxu1 %v2999_v46  ;;  %v827_v46 = vld [vmem:[#allocation8 + $0x420] sm:$0xff] }
 0x1e2   :  { %1374 = vmatmul.mubr.f32.gmra.mxu0 %v3132_v21  ;;  %2403 = vmatpush3.msra.mxu1 %v830_v15 }
 0x1e3   :  { %1238 = vmatprep.mubr.f32.mxu1 %v3152_v44  ;;  %1378 = vmatprep.mubr.f32.mxu0 %v3001_v61 }
 0x1e4   :  { %2404 = vmatprep.subr.mxu1 %v829_v7 }
 0x1e5   :  { %1239 = vmatmul.mubr.f32.gmra.mxu1 %v3001_v61  ;;  %v826_v61 = vld [vmem:[#allocation8 + $0x418] sm:$0xff] }
 0x1e6   :  { %1379 = vmatmul.mubr.f32.gmra.mxu0 %v3140_v55  ;;  %2405 = vmatpush3.msra.mxu1 %v829_v7 }
 0x1e7   :  { %1243 = vmatprep.mubr.f32.mxu1 %v3160_v3  ;;  %1383 = vmatprep.mubr.f32.mxu0 %v3003_v6 }
 0x1e8   :  { %2406 = vmatprep.subr.mxu1 %v828_v43 }
 0x1e9   :  { %1244 = vmatmul.mubr.f32.gmra.mxu1 %v3003_v6  ;;  %v825_v6 = vld [vmem:[#allocation8 + $0x410] sm:$0xff] }
 0x1ea   :  { %1384 = vmatmul.mubr.f32.gmra.mxu0 %v3148_v40  ;;  %2407 = vmatpush3.msra.mxu1 %v828_v43 }
 0x1eb   :  { %1248 = vmatprep.mubr.f32.mxu1 %v3168_v24  ;;  %1388 = vmatprep.mubr.f32.mxu0 %v3005_v11 }
 0x1ec   :  { %2408 = vmatprep.subr.mxu1 %v827_v46 }
 0x1ed   :  { %1249 = vmatmul.mubr.f32.gmra.mxu1 %v3005_v11  ;;  %v824_v11 = vld [vmem:[#allocation8 + $0x408] sm:$0xff] }
 0x1ee   :  { %1389 = vmatmul.mubr.f32.gmra.mxu0 %v3156_v51  ;;  %2409 = vmatpush3.msra.mxu1 %v827_v46 }
 0x1ef   :  { %1253 = vmatprep.mubr.f32.mxu1 %v3176_v57  ;;  %1393 = vmatprep.mubr.f32.mxu0 %v3007_v13 }
 0x1f0   :  { %2410 = vmatprep.subr.mxu1 %v826_v61 }
 0x1f1   :  { %1254 = vmatmul.mubr.f32.gmra.mxu1 %v3007_v13  ;;  %v823_v13 = vld [vmem:[#allocation8 + $0x400] sm:$0xff] }
 0x1f2   :  { %1394 = vmatmul.mubr.f32.gmra.mxu0 %v3164_v19  ;;  %2411 = vmatpush3.msra.mxu1 %v826_v61 }
 0x1f3   :  { %1258 = vmatprep.mubr.f32.mxu1 %v3184_v1  ;;  %1398 = vmatprep.mubr.f32.mxu0 %v3009_v48 }
 0x1f4   :  { %2412 = vmatprep.subr.mxu1 %v825_v6 }
 0x1f5   :  { %1259 = vmatmul.mubr.f32.gmra.mxu1 %v3009_v48  ;;  %v678_v48 = vld [vmem:[#allocation2 + $0x131] sm:$0xff] }
 0x1f6   :  { %1399 = vmatmul.mubr.f32.gmra.mxu0 %v3172_v27  ;;  %2413 = vmatpush3.msra.mxu1 %v825_v6 }
 0x1f7   :  { %1263 = vmatprep.mubr.f32.mxu1 %v3191_v30  ;;  %1403 = vmatprep.mubr.f32.mxu0 %v3014_v16 }
 0x1f8   :  { %2414 = vmatprep.subr.mxu1 %v824_v11 }
 0x1f9   :  { %1264 = vmatmul.mubr.f32.gmra.mxu1 %v3014_v16  ;;  %v686_v16 = vld [vmem:[#allocation2 + $0x92] sm:$0xff] }
 0x1fa   :  { %1404 = vmatmul.mubr.f32.gmra.mxu0 %v3180_v42  ;;  %2415 = vmatpush3.msra.mxu1 %v824_v11 }
 0x1fb   :  { %1268 = vmatprep.mubr.f32.mxu1 %v645_v17  ;;  %1408 = vmatprep.mubr.f32.mxu0 %v677_v0 }
 0x1fc   :  { %2416 = vmatprep.subr.mxu1 %v823_v13 }
 0x1fd   :  { %1269 = vmatmul.mubr.f32.gmra.mxu1 %v677_v0 }
 0x1fe   :  { %1409 = vmatmul.mubr.f32.gmra.mxu0 %v3187_v58  ;;  %2417 = vmatpush3.msra.mxu1 %v823_v13 }
 0x1ff   :  { %2418 = vmatprep.mubr.f32.mxu1 %v3094_v23  ;;  %1413 = vmatprep.mubr.f32.mxu0 %v678_v48  ;;  %v694_v23 = vld [vmem:[#allocation2 + $0x132] sm:$0xff] }
 0x201   :  { %2419 = vmatmul.mubr.f32.vlgmr.msra.gmra.mxu1 %v3102_v29  ;;  %v2035_v29 = vpop.f32.mrf.mxu1 }
 0x202   :  { %1414 = vmatmul.mubr.f32.gmra.mxu0 %v3132_v21  ;;  %2421 = vmatprep.mubr.f32.mxu1 %v3110_v56 }
 0x205   :  { %2422 = vmatmul.mubr.f32.gmra.mxu1 %v3118_v33 }
 0x206   :  { %2424 = vmatprep.mubr.f32.mxu1 %v3126_v8  ;;  %v2036_v8 = vadd.f32 %v2035_v29, %v2034_v25 }
 0x209   :  { %2425 = vmatmul.mubr.f32.gmra.mxu1 %v3135_v18 }
 0x20a   :  { %2427 = vmatprep.mubr.f32.mxu1 %v3220_v22 }
 0x20d   :  { %2428 = vmatmul.mubr.f32.gmra.mxu1 %v686_v16 }
 0x20e   :  { %2430 = vmatprep.mubr.f32.mxu1 %v3152_v44 }
 0x211   :  { %2431 = vmatmul.mubr.f32.gmra.mxu1 %v3160_v3 }
 0x212   :  { %2433 = vmatprep.mubr.f32.mxu1 %v3168_v24 }
 0x215   :  { %2434 = vmatmul.mubr.f32.gmra.mxu1 %v3176_v57 }
 0x216   :  { %2436 = vmatprep.mubr.f32.mxu1 %v3184_v1 }
 0x219   :  { %2437 = vmatmul.mubr.f32.gmra.mxu1 %v3191_v30 }
 0x21a   :  { %2439 = vmatprep.mubr.f32.mxu1 %v645_v17 }
 0x21d   :  { %2440 = vmatmul.mubr.f32.gmra.mxu1 %v694_v23 }
 0x245   :  { %v2037_v52 = vpop.f32.mrf.mxu1  ;;  %v2114_v56 = vpop.f32.mrf.mxu0 }
 0x247   :  { %v2038_v12 = vpop.f32.mrf.mxu1  ;;  %v2115_v39 = vpop.f32.mrf.mxu0 }
 0x248   :  { %v2039_v33 = vadd.f32 %v2038_v12, %v2037_v52  ;;  %v2116_v35 = vadd.f32 %v2115_v39, %v2114_v56 }
 0x249   :  { %v2040_v21 = vpop.f32.mrf.mxu1 }
 0x24a   :  { %v2117_v18 = vpop.f32.mrf.mxu0  ;;  %v3268_v55 = vadd.f32 %v2116_v35, %v2036_v8 }
 0x24b   :  { %v2041_v31 = vpop.f32.mrf.mxu1 }
 0x24c   :  { %v2042_v40 = vadd.f32 %v2041_v31, %v2040_v21  ;;  %v2118_v4 = vpop.f32.mrf.mxu0 }
 0x24d   :  { %v2119_v44 = vadd.f32 %v2118_v4, %v2117_v18  ;;  %v2043_v51 = vpop.f32.mrf.mxu1 }
 0x24e   :  { %v2120_v3 = vpop.f32.mrf.mxu0 }
 0x24f   :  { %v3270_v19 = vadd.f32 %v2119_v44, %v2039_v33  ;;  %v2044_v24 = vpop.f32.mrf.mxu1 }
 0x250   :  { %v2045_v27 = vadd.f32 %v2044_v24, %v2043_v51  ;;  %v2121_v57 = vpop.f32.mrf.mxu0 }
 0x251   :  { %v2122_v42 = vadd.f32 %v2121_v57, %v2120_v3  ;;  %v2046_v1 = vpop.f32.mrf.mxu1 }
 0x252   :  { %v2123_v58 = vpop.f32.mrf.mxu0 }
 0x253   :  { %v3272_v30 = vadd.f32 %v2122_v42, %v2042_v40  ;;  %v2047_v34 = vpop.f32.mrf.mxu1 }
 0x254   :  { %v2048_v2 = vadd.f32 %v2047_v34, %v2046_v1  ;;  %v2124_v5 = vpop.f32.mrf.mxu0 }
 0x255   :  { %v2125_v37 = vadd.f32 %v2124_v5, %v2123_v58  ;;  %v2049_v59 = vpop.f32.mrf.mxu1 }
 0x256   :  { %v2126_v9 = vpop.f32.mrf.mxu0 }
 0x257   :  { %v3274_v60 = vadd.f32 %v2125_v37, %v2045_v27  ;;  %v2050_v22 = vpop.f32.mrf.mxu1 }
 0x258   :  { %v2051_v63 = vadd.f32 %v2050_v22, %v2049_v59  ;;  %v2127_v15 = vpop.f32.mrf.mxu0 }
 0x259   :  { %v2128_v7 = vadd.f32 %v2127_v15, %v2126_v9  ;;  %v2052_v43 = vpop.f32.mrf.mxu1 }
 0x25a   :  { %v2129_v46 = vpop.f32.mrf.mxu0 }
 0x25b   :  { %v3276_v61 = vadd.f32 %v2128_v7, %v2048_v2  ;;  %v2053_v6 = vpop.f32.mrf.mxu1 }
 0x25c   :  { %v2054_v11 = vadd.f32 %v2053_v6, %v2052_v43  ;;  %v2130_v13 = vpop.f32.mrf.mxu0 }
 0x25d   :  { %v2131_v17 = vadd.f32 %v2130_v13, %v2129_v46  ;;  %v2055_v0 = vpop.f32.mrf.mxu1 }
 0x25e   :  { %v2132_v48 = vpop.f32.mrf.mxu0 }
 0x25f   :  { %v3278_v16 = vadd.f32 %v2131_v17, %v2051_v63  ;;  %v2056_v23 = vpop.f32.mrf.mxu1 }
 0x260   :  { %v2057_v25 = vadd.f32 %v2056_v23, %v2055_v0  ;;  %v2133_v29 = vpop.f32.mrf.mxu0 }
 0x261   :  { %v2134_v52 = vadd.f32 %v2133_v29, %v2132_v48  ;;  %v2058_v56 = vpop.f32.mrf.mxu1 }
 0x262   :  { %v2135_v12 = vpop.f32.mrf.mxu0 }
 0x263   :  { %v3280_v33 = vadd.f32 %v2134_v52, %v2054_v11  ;;  %v2059_v39 = vpop.f32.mrf.mxu1  ;;  %v1692_v52 = vld [vmem:[#allocation9 + $0x78] sm:$0xff] }
 0x264   :  { %v2060_v8 = vadd.f32 %v2059_v39, %v2058_v56  ;;  %v2136_v35 = vpop.f32.mrf.mxu0  ;;  %2442 = vmatprep.subr.mxu1 %v1692_v52 }
 0x265   :  { %v2137_v21 = vadd.f32 %v2136_v35, %v2135_v12  ;;  %v2061_v18 = vpop.f32.mrf.mxu1  ;;  %2443 = vmatpush3.msra.mxu1 %v1692_v52  ;;  %v1682_v52 = vld [vmem:[#allocation9 + $0x28] sm:$0xff] }
 0x266   :  { %v2138_v31 = vpop.f32.mrf.mxu0 }
 0x267   :  { %v3282_v40 = vadd.f32 %v2137_v21, %v2057_v25  ;;  %v2062_v4 = vpop.f32.mrf.mxu1 }
 0x268   :  { %v2063_v44 = vadd.f32 %v2062_v4, %v2061_v18  ;;  %v2139_v51 = vpop.f32.mrf.mxu0  ;;  %v1690_v4 = vld [vmem:[#allocation9 + $0x68] sm:$0xff] }
 0x269   :  { %v2140_v3 = vadd.f32 %v2139_v51, %v2138_v31  ;;  %v2064_v24 = vpop.f32.mrf.mxu1 }
 0x26a   :  { %v2141_v27 = vpop.f32.mrf.mxu0 }
 0x26b   :  { %v3284_v57 = vadd.f32 %v2140_v3, %v2060_v8  ;;  %v2065_v42 = vpop.f32.mrf.mxu1  ;;  %v1691_v8 = vld [vmem:[#allocation9 + $0x70] sm:$0xff] }
 0x26c   :  { %v2066_v1 = vadd.f32 %v2065_v42, %v2064_v24  ;;  %v2142_v58 = vpop.f32.mrf.mxu0  ;;  %2444 = vmatprep.subr.mxu1 %v1691_v8 }
 0x26d   :  { %v2143_v34 = vadd.f32 %v2142_v58, %v2141_v27  ;;  %v2067_v2 = vpop.f32.mrf.mxu1  ;;  %2445 = vmatpush3.msra.mxu1 %v1691_v8  ;;  %v1688_v27 = vld [vmem:[#allocation9 + $0x58] sm:$0xff] }
 0x26e   :  { %v2144_v5 = vpop.f32.mrf.mxu0  ;;  %2446 = vmatprep.subr.mxu1 %v1690_v4 }
 0x26f   :  { %v3286_v37 = vadd.f32 %v2143_v34, %v2063_v44  ;;  %v2068_v59 = vpop.f32.mrf.mxu1  ;;  %v1689_v44 = vld [vmem:[#allocation9 + $0x60] sm:$0xff]  ;;  %2447 = vmatpush3.msra.mxu1 %v1690_v4 }
 0x270   :  { %v2069_v9 = vadd.f32 %v2068_v59, %v2067_v2  ;;  %v2145_v22 = vpop.f32.mrf.mxu0  ;;  %2448 = vmatprep.subr.mxu1 %v1689_v44  ;;  %v1687_v2 = vld [vmem:[#allocation9 + $0x50] sm:$0xff] }
 0x271   :  { %v2146_v63 = vadd.f32 %v2145_v22, %v2144_v5  ;;  %v2070_v15 = vpop.f32.mrf.mxu1  ;;  %2449 = vmatpush3.msra.mxu1 %v1689_v44  ;;  %v1686_v22 = vld [vmem:[#allocation9 + $0x48] sm:$0xff]  ;;  %v1679_v44 = vld [vmem:[#allocation9 + $0x10] sm:$0xff] }
 0x272   :  { %v2147_v7 = vpop.f32.mrf.mxu0  ;;  %2450 = vmatprep.subr.mxu1 %v1688_v27 }
 0x273   :  { %v3288_v43 = vadd.f32 %v2146_v63, %v2066_v1  ;;  %v2071_v46 = vpop.f32.mrf.mxu1  ;;  %2451 = vmatpush3.msra.mxu1 %v1688_v27 }
 0x274   :  { %v2072_v6 = vadd.f32 %v2071_v46, %v2070_v15  ;;  %v2148_v11 = vpop.f32.mrf.mxu0  ;;  %2452 = vmatprep.subr.mxu1 %v1687_v2  ;;  %v1685_v46 = vld [vmem:[#allocation9 + $0x40] sm:$0xff] }
 0x275   :  { %3716 = vst [vmem:[#allocation32_spill] sm:$0xff] %v3288_v43  ;;  %v2149_v13 = vadd.f32 %v2148_v11, %v2147_v7  ;;  %v2073_v17 = vpop.f32.mrf.mxu1  ;;  %2453 = vmatpush3.msra.mxu1 %v1687_v2 }
 0x276   :  { %v2150_v0 = vpop.f32.mrf.mxu0  ;;  %2454 = vmatprep.subr.mxu1 %v1686_v22 }
 0x277   :  { %v3290_v48 = vadd.f32 %v2149_v13, %v2069_v9  ;;  %v2074_v23 = vpop.f32.mrf.mxu1  ;;  %2455 = vmatpush3.msra.mxu1 %v1686_v22  ;;  %v1684_v13 = vld [vmem:[#allocation9 + $0x38] sm:$0xff] }
 0x278   :  { %v2075_v25 = vadd.f32 %v2074_v23, %v2073_v17  ;;  %v2151_v29 = vpop.f32.mrf.mxu0  ;;  %2456 = vmatprep.subr.mxu1 %v1685_v46  ;;  %v1683_v23 = vld [vmem:[#allocation9 + $0x30] sm:$0xff] }
 0x279   :  { %3717 = vst [vmem:[#allocation33_spill] sm:$0xff] %v3290_v48  ;;  %v2152_v56 = vadd.f32 %v2151_v29, %v2150_v0  ;;  %v2076_v12 = vpop.f32.mrf.mxu1  ;;  %2457 = vmatpush3.msra.mxu1 %v1685_v46 }
 0x27a   :  { %v2153_v39 = vpop.f32.mrf.mxu0  ;;  %2458 = vmatprep.subr.mxu1 %v1684_v13 }
 0x27b   :  { %v3292_v35 = vadd.f32 %v2152_v56, %v2072_v6  ;;  %v2077_v21 = vpop.f32.mrf.mxu1  ;;  %2459 = vmatpush3.msra.mxu1 %v1684_v13 }
 0x27c   :  { %v2078_v18 = vadd.f32 %v2077_v21, %v2076_v12  ;;  %v2154_v31 = vpop.f32.mrf.mxu0  ;;  %2460 = vmatprep.subr.mxu1 %v1683_v23 }
 0x27d   :  { %3718 = vst [vmem:[#allocation34_spill] sm:$0xff] %v3292_v35  ;;  %v2155_v51 = vadd.f32 %v2154_v31, %v2153_v39  ;;  %v2079_v3 = vpop.f32.mrf.mxu1  ;;  %2461 = vmatpush3.msra.mxu1 %v1683_v23  ;;  %v1681_v39 = vld [vmem:[#allocation9 + $0x20] sm:$0xff] }
 0x27e   :  { %v2156_v24 = vpop.f32.mrf.mxu0  ;;  %2462 = vmatprep.subr.mxu1 %v1682_v52 }
 0x27f   :  { %v3294_v42 = vadd.f32 %v2155_v51, %v2075_v25  ;;  %v2080_v1 = vpop.f32.mrf.mxu1  ;;  %2463 = vmatpush3.msra.mxu1 %v1682_v52 }
 0x280   :  { %v3296_v58 = vadd.f32 %v2080_v1, %v2079_v3  ;;  %v2157_v34 = vpop.f32.mrf.mxu0  ;;  %2464 = vmatprep.subr.mxu1 %v1681_v39 }
 0x281   :  { %3719 = vst [vmem:[#allocation35_spill] sm:$0xff] %v3294_v42  ;;  %v2158_v5 = vadd.f32 %v2157_v34, %v2156_v24  ;;  %v3298_v59 = vpop.f32.mrf.mxu1  ;;  %2465 = vmatpush3.msra.mxu1 %v1681_v39  ;;  %v1678_v24 = vld [vmem:[#allocation9 + $0x8] sm:$0xff]  ;;  %v1677_v34 = vld [vmem:[#allocation9] sm:$0xff] }
 0x282   :  { %3720 = vst [vmem:[#allocation36_spill] sm:$0xff] %v3296_v58  ;;  %v3300_v9 = vpop.f32.mrf.mxu0 }
 0x283   :  { %v3302_v63 = vadd.f32 %v2158_v5, %v2078_v18  ;;  %v3304_v15 = vpop.f32.mrf.mxu1  ;;  %v1680_v18 = vld [vmem:[#allocation9 + $0x18] sm:$0xff] }
 0x284   :  { %v3306_v7 = vpop.f32.mrf.mxu0  ;;  %2466 = vmatprep.subr.mxu1 %v1680_v18 }
 0x285   :  { %3721 = vst [vmem:[#allocation37_spill] sm:$0xff] %v3302_v63  ;;  %v3308_v6 = vpop.f32.mrf.mxu1  ;;  %2467 = vmatpush3.msra.mxu1 %v1680_v18 }
 0x286   :  { %v3310_v11 = vpop.f32.mrf.mxu0  ;;  %2468 = vmatprep.subr.mxu1 %v1679_v44 }
 0x287   :  { %v3312_v17 = vpop.f32.mrf.mxu1  ;;  %2469 = vmatpush3.msra.mxu1 %v1679_v44 }
 0x288   :  { %v3314_v0 = vpop.f32.mrf.mxu0  ;;  %2470 = vmatprep.subr.mxu1 %v1678_v24 }
 0x289   :  { %v3316_v25 = vpop.f32.mrf.mxu1  ;;  %2471 = vmatpush3.msra.mxu1 %v1678_v24 }
 0x28a   :  { %v3318_v29 = vpop.f32.mrf.mxu0  ;;  %2472 = vmatprep.subr.mxu1 %v1677_v34 }
 0x28b   :  { %v3320_v56 = vpop.f32.mrf.mxu1  ;;  %2473 = vmatpush3.msra.mxu1 %v1677_v34 }
 0x28c   :  { %v3322_v12 = vpop.f32.mrf.mxu0 }
 0x28d   :  { %v3324_v8 = vpop.f32.mrf.mxu1 }
 0x28e   :  { %v3326_v21 = vpop.f32.mrf.mxu0 }
 0x28f   :  { %v3328_v31 = vpop.f32.mrf.mxu1 }
 0x290   :  { %v3330_v4 = vpop.f32.mrf.mxu0 }
 0x291   :  { %v3332_v51 = vpop.f32.mrf.mxu1 }
 0x292   :  { %v2283_v3 = vpop.f32.mrf.mxu0 }
 0x293   :  { %v3334_v27 = vpop.f32.mrf.mxu1 }
 0x294   :  { %v2284_v1 = vpop.f32.mrf.mxu0 }
 0x295   :  { %v2209_v2 = vpop.f32.mrf.mxu1 }
 0x296   :  { %v3336_v5 = vpop.f32.mrf.mxu0 }
 0x297   :  { %v2210_v22 = vpop.f32.mrf.mxu1 }
 0x298   :  { %v3338_v46 = vpop.f32.mrf.mxu0 }
 0x299   :  { %v3340_v13 = vpop.f32.mrf.mxu1 }
 0x29a   :  { %v2289_v23 = vpop.f32.mrf.mxu0 }
 0x29b   :  { %v3342_v52 = vpop.f32.mrf.mxu1 }
 0x29c   :  { %v2290_v39 = vpop.f32.mrf.mxu0 }
 0x29d   :  { %v3344_v18 = vpop.f32.mrf.mxu1 }
 0x29e   :  { %v3346_v44 = vpop.f32.mrf.mxu0 }
 0x29f   :  { %v2216_v14 = vpop.f32.mrf.mxu1 }
 0x2a0   :  { %v3348_v20 = vpop.f32.mrf.mxu0 }
 0x2a1   :  { %v3350_v62 = vpop.f32.mrf.mxu1 }
 0x2a2   :  { %v3352_v24 = vpop.f32.mrf.mxu0 }
 0x2a3   :  { %v3354_v50 = vpop.f32.mrf.mxu1 }
 0x2a4   :  { %v3356_v34 = vpop.f32.mrf.mxu0 }
 0x2a5   :  { %v3358_v41 = vpop.f32.mrf.mxu1 }
 0x2a6   :  { %v3360_v32 = vpop.f32.mrf.mxu0 }
 0x2a7   :  { %v3362_v28 = vpop.f32.mrf.mxu1 }
 0x2a8   :  { %v3364_v10 = vpop.f32.mrf.mxu0 }
 0x2a9   :  { %v3366_v54 = vpop.f32.mrf.mxu1 }
 0x2aa   :  { %v3368_v38 = vpop.f32.mrf.mxu0 }
 0x2ab   :  { %v3370_v49 = vpop.f32.mrf.mxu1 }
 0x2ac   :  { %3722 = vst [vmem:[#allocation38_spill] sm:$0xff] %v3370_v49  ;;  %v3372_v47 = vpop.f32.mrf.mxu0 }
 0x2ad   :  { %v3374_v45 = vpop.f32.mrf.mxu1 }
 0x2ae   :  { %v3376_v36 = vpop.f32.mrf.mxu0 }
 0x2af   :  { %3723 = vst [vmem:[#allocation39_spill] sm:$0xff] %v3376_v36  ;;  %v3378_v26 = vpop.f32.mrf.mxu1  ;;  %v2199_v36 = vadd.f32 %v3312_v17, %v3308_v6  ;;  %v2202_v6 = vadd.f32 %v3320_v56, %v3316_v25  ;;  %v2205_v17 = vadd.f32 %v3328_v31, %v3324_v8  ;;  %v2211_v56 = vadd.f32 %v2210_v22, %v2209_v2 }
 0x2b0   :  { %3724 = vst [vmem:[#allocation40_spill] sm:$0xff] %v3378_v26  ;;  %v3380_v53 = vpop.f32.mrf.mxu0 }
 0x2b1   :  { %3725 = vst [vmem:[#allocation41_spill] sm:$0xff] %v3380_v53  ;;  %v3382_v63 = vpop.f32.mrf.mxu1  ;;  %v1211_v25 = vadd.f32 %v2205_v17, %v3274_v60 }
 0x2b2   :  { %v3384_v58 = vpop.f32.mrf.mxu0 }
 0x2b3   :  { %3726 = vst [vmem:[#allocation42_spill] sm:$0xff] %v3384_v58  ;;  %v3386_v42 = vpop.f32.mrf.mxu1  ;;  %v2196_v58 = vadd.f32 %v3304_v15, %v3298_v59 }
 0x2b4   :  { %3727 = vst [vmem:[#allocation43_spill] sm:$0xff] %v3386_v42  ;;  %v3390_v48 = vpop.f32.mrf.mxu0  ;;  %v2279_v42 = vadd.f32 %v3322_v12, %v3318_v29  ;;  %v2282_v29 = vadd.f32 %v3330_v4, %v3326_v21 }
 0x2b5   :  { %v3388_v35 = vpop.f32.mrf.mxu1  ;;  %3729 = vst [vmem:[#allocation45_spill] sm:$0xff] %v3390_v48  ;;  %v1201_v48 = vadd.f32 %v2199_v36, %v3270_v19  ;;  %v1196_v59 = vadd.f32 %v2196_v58, %v3268_v55  ;;  %v2285_v36 = vadd.f32 %v2284_v1, %v2283_v3  ;;  %v2208_v55 = vadd.f32 %v3334_v27, %v3332_v51 }
 0x2b6   :  { %3728 = vst [vmem:[#allocation44_spill] sm:$0xff] %v3388_v35  ;;  %v3398_v26 = vpop.f32.mrf.mxu0  ;;  %v1221_v51 = vadd.f32 %v2211_v56, %v3278_v16  ;;  %v2214_v27 = vadd.f32 %v3342_v52, %v3340_v13  ;;  %v2217_v1 = vadd.f32 %v2216_v14, %v3344_v18  ;;  %v2294_v16 = vadd.f32 %v3348_v20, %v3346_v44 }
 0x2b7   :  { %v3392_v43 = vpop.f32.mrf.mxu1  ;;  %3731 = vst [vmem:[#allocation47_spill] sm:$0xff] %v3398_v26  ;;  %v1346_v15 = vadd.f32 %v2279_v42, %v1201_v48  ;;  %v2291_v42 = vadd.f32 %v2290_v39, %v2289_v23  ;;  %v1356_v58 = vadd.f32 %v2285_v36, %v1211_v25  ;;  %v2220_v14 = vadd.f32 %v3354_v50, %v3350_v62 }
 0x2b8   :  { %v2223_v20 = vadd.f32 %v3362_v28, %v3358_v41  ;;  %v2303_v28 = vadd.f32 %v3372_v47, %v3368_v38 }
 0x2b9   :  { %v3394_v49 = vpop.f32.mrf.mxu1  ;;  %v1366_v13 = vadd.f32 %v2291_v42, %v1221_v51 }
 0x2ba   :  { %3730 = vst [vmem:[#allocation46_spill] sm:$0xff] %v3394_v49  ;;  %v2276_v49 = vadd.f32 %v3314_v0, %v3310_v11  ;;  %v1206_v0 = vadd.f32 %v2202_v6, %v3272_v30  ;;  %v3453_v6 = vadd.f32 %v3306_v7, %v3300_v9  ;;  %v1226_v9 = vadd.f32 %v2214_v27, %v3280_v33  ;;  %v3738_v27 = vld [vmem:[#allocation42_spill] sm:$0xff] }
 0x2bb   :  { %v3400_v53 = vpop.f32.mrf.mxu1  ;;  %v1231_v7 = vadd.f32 %v2217_v1, %v3282_v40  ;;  %v1236_v33 = vadd.f32 %v2220_v14, %v3284_v57  ;;  %v2300_v40 = vadd.f32 %v3364_v10, %v3360_v32  ;;  %v1241_v56 = vadd.f32 %v2223_v20, %v3286_v37  ;;  %v3736_v37 = vld [vmem:[#allocation41_spill] sm:$0xff]  ;;  %v3740_v14 = vld [vmem:[#allocation32_spill] sm:$0xff] }
 0x2bc   :  { %3732 = vst [vmem:[#allocation48_spill] sm:$0xff] %v3400_v53  ;;  %v3415_v53 = vpop.f32.mrf.mxu0  ;;  %v1341_v11 = vadd.f32 %v2276_v49, %v1196_v59  ;;  %v1351_v4 = vadd.f32 %v2282_v29, %v1206_v0  ;;  %v2288_v49 = vadd.f32 %v3338_v46, %v3336_v5  ;;  %v1216_v5 = vadd.f32 %v2208_v55, %v3276_v61  ;;  %v3734_v55 = vld [vmem:[#allocation40_spill] sm:$0xff]  ;;  %v3739_v1 = vld [vmem:[#allocation45_spill] sm:$0xff] }
 0x2bd   :  { %v3406_v35 = vpop.f32.mrf.mxu1  ;;  %v2297_v61 = vadd.f32 %v3356_v34, %v3352_v24  ;;  %v1371_v36 = vadd.f32 %v2294_v16, %v1226_v9  ;;  %v2229_v10 = vadd.f32 %v3734_v55, %v3374_v45  ;;  %v1381_v51 = vadd.f32 %v2300_v40, %v1236_v33 }
 0x2be   :  { %v3426_v8 = vpop.f32.mrf.mxu0  ;;  %v1361_v59 = vadd.f32 %v2288_v49, %v1216_v5  ;;  %v3735_v49 = vld [vmem:[#allocation39_spill] sm:$0xff] }
 0x2bf   :  { %v3417_v26 = vpop.f32.mrf.mxu1  ;;  %v1376_v25 = vadd.f32 %v2297_v61, %v1231_v7  ;;  %v3744_v33 = vld [vmem:[#allocation47_spill] sm:$0xff] }
 0x2c0   :  { %v3444_v2 = vpop.f32.mrf.mxu0  ;;  %v2312_v40 = vadd.f32 %v3415_v53, %v3744_v33  ;;  %v2241_v53 = vadd.f32 %v3417_v26, %v3406_v35 }
 0x2c1   :  { %v2420_v19 = vpop.f32.mrf.mxu1 }
 0x2c2   :  { %v3422_v12 = vadd.f32 %v2420_v19, %v1346_v15  ;;  %v3468_v44 = vpop.f32.mrf.mxu0 }
 0x2c3   :  { %v1485_v31 = vpop.f32.mrf.mxu1 }
 0x2c4   :  { %v3430_v48 = vadd.f32 %v1485_v31, %v1341_v11  ;;  %v1586_v30 = vmul.f32 %v3422_v12, %v3422_v12  ;;  %v3733_v31 = vld [vmem:[#allocation38_spill] sm:$0xff]  ;;  %v2317_v32 = vpop.f32.mrf.mxu0 }
 0x2c5   :  { %v2423_v21 = vpop.f32.mrf.mxu1  ;;  %v2226_v57 = vadd.f32 %v3733_v31, %v3366_v54  ;;  %v3737_v54 = vld [vmem:[#allocation43_spill] sm:$0xff]  ;;  %v3746_v31 = vld [vmem:[#allocation46_spill] sm:$0xff] }
 0x2c6   :  { %v1564_v60 = vadd.f32 %v3422_v12, %v3430_v48  ;;  %v1585_v3 = vmul.f32 %v3430_v48, %v3430_v48  ;;  %v3447_v23 = vadd.f32 %v2423_v21, %v1356_v58 }
 0x2c7   :  { %v1495_v22 = vpop.f32.mrf.mxu1 }
 0x2c8   :  { %v1601_v46 = vadd.f32 %v1586_v30, %v1585_v3  ;;  %v3449_v39 = vadd.f32 %v1495_v22, %v1351_v4  ;;  %v1588_v24 = vmul.f32 %v3447_v23, %v3447_v23  ;;  %v2306_v30 = vadd.f32 %v3736_v37, %v3735_v49  ;;  %v3748_v49 = vld [vmem:[#allocation36_spill] sm:$0xff] }
 0x2c9   :  { %v2426_v52 = vpop.f32.mrf.mxu1  ;;  %v1386_v3 = vadd.f32 %v2303_v28, %v1241_v56  ;;  %v2309_v22 = vadd.f32 %v3739_v1, %v3738_v27  ;;  %v1126_v37 = vadd.f32 %v3453_v6, %v3748_v49  ;;  %v3749_v27 = vld [vmem:[#allocation37_spill] sm:$0xff] }
 0x2ca   :  { %v1565_v18 = vadd.f32 %v1564_v60, %v3449_v39  ;;  %v1587_v17 = vmul.f32 %v3449_v39, %v3449_v39  ;;  %v3470_v50 = vadd.f32 %v2426_v52, %v1366_v13  ;;  %v2232_v60 = vadd.f32 %v3737_v54, %v3382_v63  ;;  %v3741_v52 = vld [vmem:[#allocation33_spill] sm:$0xff]  ;;  %v2319_v63 = vpop.f32.mrf.mxu0 }
 0x2cb   :  { %v1505_v62 = vpop.f32.mrf.mxu1  ;;  %v1246_v13 = vadd.f32 %v2226_v57, %v3740_v14  ;;  %v1251_v61 = vadd.f32 %v2229_v10, %v3741_v52  ;;  %v3747_v57 = vld [vmem:[#allocation48_spill] sm:$0xff] }
 0x2cc   :  { %v1602_v34 = vadd.f32 %v1601_v46, %v1587_v17  ;;  %v3474_v15 = vadd.f32 %v1505_v62, %v1361_v59  ;;  %v1566_v29 = vadd.f32 %v1565_v18, %v3447_v23  ;;  %v1590_v47 = vmul.f32 %v3470_v50, %v3470_v50  ;;  %v3742_v18 = vld [vmem:[#allocation44_spill] sm:$0xff]  ;;  %v2320_v10 = vpop.f32.mrf.mxu0 }
 0x2cd   :  { %v2429_v41 = vpop.f32.mrf.mxu1  ;;  %v2235_v17 = vadd.f32 %v3392_v43, %v3742_v18  ;;  %v2315_v43 = vadd.f32 %v3444_v2, %v3426_v8  ;;  %v2238_v55 = vadd.f32 %v3747_v57, %v3746_v31  ;;  %v2321_v35 = vadd.f32 %v2320_v10, %v2319_v63 }
 0x2ce   :  { %v1567_v19 = vadd.f32 %v1566_v29, %v3474_v15  ;;  %v1589_v11 = vmul.f32 %v3474_v15, %v3474_v15  ;;  %v1603_v0 = vadd.f32 %v1602_v34, %v1588_v24  ;;  %v3492_v58 = vadd.f32 %v2429_v41, %v1376_v25  ;;  %v3743_v34 = vld [vmem:[#allocation34_spill] sm:$0xff]  ;;  %v3745_v25 = vld [vmem:[#allocation35_spill] sm:$0xff] }
 0x2cf   :  { %v1515_v38 = vpop.f32.mrf.mxu1  ;;  %v1256_v29 = vadd.f32 %v2232_v60, %v3743_v34  ;;  %v1391_v41 = vadd.f32 %v2306_v30, %v1246_v13  ;;  %v1261_v56 = vadd.f32 %v2235_v17, %v3745_v25  ;;  %v2318_v30 = vadd.f32 %v2317_v32, %v3468_v44 }
 0x2d0   :  { %v1604_v42 = vadd.f32 %v1603_v0, %v1589_v11  ;;  %v3494_v21 = vadd.f32 %v1515_v38, %v1371_v36  ;;  %v1568_v4 = vadd.f32 %v1567_v19, %v3470_v50  ;;  %v1592_v7 = vmul.f32 %v3492_v58, %v3492_v58 }
 0x2d1   :  { %v2432_v45 = vpop.f32.mrf.mxu1  ;;  %v1396_v0 = vadd.f32 %v2309_v22, %v1251_v61  ;;  %v1406_v54 = vadd.f32 %v2315_v43, %v1261_v56  ;;  %v1401_v26 = vadd.f32 %v2312_v40, %v1256_v29  ;;  %v1266_v1 = vadd.f32 %v2238_v55, %v3749_v27 }
 0x2d2   :  { %v1569_v5 = vadd.f32 %v1568_v4, %v3494_v21  ;;  %v1591_v46 = vmul.f32 %v3494_v21, %v3494_v21  ;;  %v1605_v16 = vadd.f32 %v1604_v42, %v1590_v47  ;;  %v3510_v59 = vadd.f32 %v2432_v45, %v1386_v3 }
 0x2d3   :  { %v1525_v9 = vpop.f32.mrf.mxu1  ;;  %v1271_v22 = vadd.f32 %v2241_v53, %v1126_v37  ;;  %v1411_v13 = vadd.f32 %v2318_v30, %v1266_v1 }
 0x2d4   :  { %v1606_v20 = vadd.f32 %v1605_v16, %v1591_v46  ;;  %v3514_v62 = vadd.f32 %v1525_v9, %v1381_v51  ;;  %v1570_v24 = vadd.f32 %v1569_v5, %v3492_v58  ;;  %v1594_v8 = vmul.f32 %v3510_v59, %v3510_v59 }
 0x2d5   :  { %v2435_v28 = vpop.f32.mrf.mxu1  ;;  %v1416_v17 = vadd.f32 %v2321_v35, %v1271_v22 }
 0x2d6   :  { %v1571_v36 = vadd.f32 %v1570_v24, %v3514_v62  ;;  %v1593_v19 = vmul.f32 %v3514_v62, %v3514_v62  ;;  %v1607_v11 = vadd.f32 %v1606_v20, %v1592_v7  ;;  %v3532_v38 = vadd.f32 %v2435_v28, %v1396_v0 }
 0x2d7   :  { %v1535_v2 = vpop.f32.mrf.mxu1 }
 0x2d8   :  { %v1608_v47 = vadd.f32 %v1607_v11, %v1593_v19  ;;  %v3534_v42 = vadd.f32 %v1535_v2, %v1391_v41  ;;  %v1572_v4 = vadd.f32 %v1571_v36, %v3510_v59  ;;  %v1596_v6 = vmul.f32 %v3532_v38, %v3532_v38 }
 0x2d9   :  { %v2438_v60 = vpop.f32.mrf.mxu1 }
 0x2da   :  { %v1573_v3 = vadd.f32 %v1572_v4, %v3534_v42  ;;  %v1595_v45 = vmul.f32 %v3534_v42, %v3534_v42  ;;  %v1609_v51 = vadd.f32 %v1608_v47, %v1594_v8  ;;  %v3544_v5 = vadd.f32 %v2438_v60, %v1406_v54 }
 0x2db   :  { %v1545_v46 = vpop.f32.mrf.mxu1 }
 0x2dc   :  { %v1610_v44 = vadd.f32 %v1609_v51, %v1595_v45  ;;  %v3548_v32 = vadd.f32 %v1545_v46, %v1401_v26  ;;  %v1574_v16 = vadd.f32 %v1573_v3, %v3532_v38  ;;  %v1598_v63 = vmul.f32 %v3544_v5, %v3544_v5 }
 0x2dd   :  { %v2441_v14 = vpop.f32.mrf.mxu1 }
 0x2de   :  { %v1575_v52 = vadd.f32 %v1574_v16, %v3548_v32  ;;  %v1597_v61 = vmul.f32 %v3548_v32, %v3548_v32  ;;  %v1611_v18 = vadd.f32 %v1610_v44, %v1596_v6  ;;  %v3556_v20 = vadd.f32 %v2441_v14, %v1416_v17 }
 0x2df   :  { %v1555_v9 = vpop.f32.mrf.mxu1 }
 0x2e0   :  { %v1612_v7 = vadd.f32 %v1611_v18, %v1597_v61  ;;  %v3558_v24 = vadd.f32 %v1555_v9, %v1411_v13  ;;  %v1576_v34 = vadd.f32 %v1575_v52, %v3544_v5  ;;  %v1600_v43 = vmul.f32 %v3556_v20, %v3556_v20 }
 0x2e2   :  { %v1577_v29 = vadd.f32 %v1576_v34, %v3558_v24  ;;  %v1599_v33 = vmul.f32 %v3558_v24, %v3558_v24  ;;  %v1613_v40 = vadd.f32 %v1612_v7, %v1598_v63 }
 0x2e4   :  { %v1578_v28 = vadd.f32 %v1577_v29, %v3556_v20  ;;  %v1614_v41 = vadd.f32 %v1613_v40, %v1599_v33 }
 0x2e6   :  { %v1579_v36 = vrot.slane %v1578_v28, 4  ;;  %v1615_v19 = vadd.f32 %v1614_v41, %v1600_v43 }
 0x2e8   :  { %v1580_v11 = vadd.f32 %v1579_v36, %v1578_v28  ;;  %v1616_v0 = vrot.slane %v1615_v19, 4 }
 0x2ea   :  { %v1581_v25 = vrot.slane %v1580_v11, 2  ;;  %v1617_v56 = vadd.f32 %v1616_v0, %v1615_v19 }
 0x2ec   :  { %v1582_v31 = vadd.f32 %v1581_v25, %v1580_v11  ;;  %v1618_v57 = vrot.slane %v1617_v56, 2 }
 0x2ee   :  { %v1583_v55 = vrot.slane %v1582_v31, 1  ;;  %v1619_v53 = vadd.f32 %v1618_v57, %v1617_v56 }
 0x2f0   :  { %v1584_v10 = vadd.f32 %v1583_v55, %v1582_v31  ;;  %v1620_v8 = vrot.slane %v1619_v53, 1 }
 0x2f2   :  { %v1621_v2 = vadd.f32 %v1620_v8, %v1619_v53  ;;  %v1622_v47 = vmul.f32 0.0078125, %v1584_v10 }
 0x2f4   :  { %v1623_v4 = vmul.f32 0.0078125, %v1621_v2  ;;  %v1624_v49 = vmul.f32 %v1622_v47, %v1622_v47  ;;  %v1641_v37 = vsub.f32 %v3558_v24, %v1622_v47  ;;  %v1627_v30 = vsub.f32 %v3430_v48, %v1622_v47 }
 0x2f5   :  { %v1628_v54 = vsub.f32 %v3422_v12, %v1622_v47  ;;  %v1629_v60 = vsub.f32 %v3449_v39, %v1622_v47  ;;  %v1630_v26 = vsub.f32 %v3447_v23, %v1622_v47  ;;  %v1631_v35 = vsub.f32 %v3474_v15, %v1622_v47 }
 0x2f6   :  { %v1625_v3 = vsub.f32 %v1623_v4, %v1624_v49  ;;  %v1632_v45 = vsub.f32 %v3470_v50, %v1622_v47  ;;  %v1633_v51 = vsub.f32 %v3494_v21, %v1622_v47  ;;  %v1634_v27 = vsub.f32 %v3492_v58, %v1622_v47 }
 0x2f7   :  { %v1635_v1 = vsub.f32 %v3514_v62, %v1622_v47  ;;  %v1636_v22 = vsub.f32 %v3510_v59, %v1622_v47  ;;  %v1637_v48 = vsub.f32 %v3534_v42, %v1622_v47  ;;  %v1638_v12 = vsub.f32 %v3532_v38, %v1622_v47 }
 0x2f8   :  { %v1626_v39 = vmax.f32 %v1625_v3, 0.0  ;;  %v1639_v23 = vsub.f32 %v3548_v32, %v1622_v47  ;;  %v1640_v15 = vsub.f32 %v3544_v5, %v1622_v47  ;;  %v1642_v46 = vsub.f32 %v3556_v20, %v1622_v47 }
 0x2fa   :  { %v1643_v50 = vadd.f32 1e-05, %v1626_v39 }
 0x2fc   :  { %2512 = vrsqrt.f32 %v1643_v50 }
 0x309   :  { %v2513_v21 = vpop.eup %2512 }
 0x30a   :  { %v1645_v6 = vmul.f32 %v2513_v21, %v1627_v30  ;;  %v1646_v58 = vmul.f32 %v2513_v21, %v1628_v54  ;;  %v1647_v44 = vmul.f32 %v2513_v21, %v1629_v60  ;;  %v1648_v62 = vmul.f32 %v2513_v21, %v1630_v26 }
 0x30b   :  { %v1649_v16 = vmul.f32 %v2513_v21, %v1631_v35  ;;  %v1650_v59 = vmul.f32 %v2513_v21, %v1632_v45  ;;  %v1651_v14 = vmul.f32 %v2513_v21, %v1633_v51  ;;  %v1652_v42 = vmul.f32 %v2513_v21, %v1634_v27 }
 0x30c   :  { %v1661_v13 = vmax.f32 %v1645_v6, 0.0  ;;  %v1662_v38 = vmax.f32 %v1646_v58, 0.0  ;;  %v1663_v52 = vmax.f32 %v1647_v44, 0.0  ;;  %v1653_v32 = vmul.f32 %v2513_v21, %v1635_v1 }
 0x30d   :  { %v1654_v61 = vmul.f32 %v2513_v21, %v1636_v22  ;;  %v1655_v5 = vmul.f32 %v2513_v21, %v1637_v48  ;;  %v1656_v18 = vmul.f32 %v2513_v21, %v1638_v12  ;;  %v1657_v17 = vmul.f32 %v2513_v21, %v1639_v23 }
 0x30e   :  { %2474 = vmatprep.mubr.f32.mxu1 %v1661_v13  ;;  %v1658_v63 = vmul.f32 %v2513_v21, %v1640_v15  ;;  %v1659_v9 = vmul.f32 %v2513_v21, %v1641_v37  ;;  %v1660_v7 = vmul.f32 %v2513_v21, %v1642_v46  ;;  %v1664_v20 = vmax.f32 %v1648_v62, 0.0 }
 0x30f   :  { %2475 = vmatmul.mubr.f32.vlgmr.msra.gmra.mxu1 %v1662_v38  ;;  %v1665_v24 = vmax.f32 %v1649_v16, 0.0  ;;  %v1666_v34 = vmax.f32 %v1650_v59, 0.0  ;;  %v1667_v29 = vmax.f32 %v1651_v14, 0.0  ;;  %v1668_v33 = vmax.f32 %v1652_v42, 0.0 }
 0x310   :  { %2477 = vmatprep.mubr.f32.mxu1 %v1663_v52  ;;  %v1669_v40 = vmax.f32 %v1653_v32, 0.0  ;;  %v1670_v43 = vmax.f32 %v1654_v61, 0.0  ;;  %v1671_v28 = vmax.f32 %v1655_v5, 0.0  ;;  %v1672_v41 = vmax.f32 %v1656_v18, 0.0 }
 0x311   :  { %v1673_v36 = vmax.f32 %v1657_v17, 0.0  ;;  %v1674_v19 = vmax.f32 %v1658_v63, 0.0  ;;  %v1675_v11 = vmax.f32 %v1659_v9, 0.0  ;;  %v1676_v0 = vmax.f32 %v1660_v7, 0.0 }
 0x313   :  { %2478 = vmatmul.mubr.f32.gmra.mxu1 %v1664_v20 }
 0x314   :  { %2480 = vmatprep.mubr.f32.mxu1 %v1665_v24 }
 0x317   :  { %2481 = vmatmul.mubr.f32.gmra.mxu1 %v1666_v34 }
 0x318   :  { %2483 = vmatprep.mubr.f32.mxu1 %v1667_v29 }
 0x31b   :  { %2484 = vmatmul.mubr.f32.gmra.mxu1 %v1668_v33 }
 0x31c   :  { %2486 = vmatprep.mubr.f32.mxu1 %v1669_v40 }
 0x31f   :  { %2487 = vmatmul.mubr.f32.gmra.mxu1 %v1670_v43 }
 0x320   :  { %2489 = vmatprep.mubr.f32.mxu1 %v1671_v28 }
 0x323   :  { %2490 = vmatmul.mubr.f32.gmra.mxu1 %v1672_v41 }
 0x324   :  { %2492 = vmatprep.mubr.f32.mxu1 %v1673_v36 }
 0x327   :  { %2493 = vmatmul.mubr.f32.gmra.mxu1 %v1674_v19 }
 0x328   :  { %2495 = vmatprep.mubr.f32.mxu1 %v1675_v11 }
 0x32b   :  { %2496 = vmatmul.mubr.f32.gmra.mxu1 %v1676_v0 }
 0x3cf   :  { %v3583_v25 = vpop.f32.mrf.mxu1 }
 0x3d0   :  { %v1860_v55 = vmul.f32 %v3583_v25, %v3583_v25 }
 0x3d1   :  { %v3585_v56 = vpop.f32.mrf.mxu1 }
 0x3d2   :  { %v1859_v31 = vmul.f32 %v3585_v56, %v3585_v56  ;;  %v1838_v53 = vadd.f32 %v3583_v25, %v3585_v56 }
 0x3d3   :  { %v3589_v57 = vpop.f32.mrf.mxu1 }
 0x3d4   :  { %v1875_v8 = vadd.f32 %v1860_v55, %v1859_v31  ;;  %v1862_v49 = vmul.f32 %v3589_v57, %v3589_v57 }
 0x3d5   :  { %v3595_v10 = vpop.f32.mrf.mxu1 }
 0x3d6   :  { %v1839_v2 = vadd.f32 %v1838_v53, %v3595_v10  ;;  %v1861_v47 = vmul.f32 %v3595_v10, %v3595_v10 }
 0x3d7   :  { %v3600_v4 = vpop.f32.mrf.mxu1 }
 0x3d8   :  { %v1876_v37 = vadd.f32 %v1875_v8, %v1861_v47  ;;  %v1840_v30 = vadd.f32 %v3589_v57, %v1839_v2  ;;  %v1864_v45 = vmul.f32 %v3600_v4, %v3600_v4 }
 0x3d9   :  { %v3605_v54 = vpop.f32.mrf.mxu1 }
 0x3da   :  { %v1841_v60 = vadd.f32 %v1840_v30, %v3605_v54  ;;  %v1863_v26 = vmul.f32 %v3605_v54, %v3605_v54  ;;  %v1877_v35 = vadd.f32 %v1876_v37, %v1862_v49 }
 0x3db   :  { %v3610_v3 = vpop.f32.mrf.mxu1 }
 0x3dc   :  { %v1878_v51 = vadd.f32 %v1877_v35, %v1863_v26  ;;  %v1842_v27 = vadd.f32 %v3600_v4, %v1841_v60  ;;  %v1866_v23 = vmul.f32 %v3610_v3, %v3610_v3 }
 0x3dd   :  { %v3615_v1 = vpop.f32.mrf.mxu1 }
 0x3de   :  { %v1843_v22 = vadd.f32 %v1842_v27, %v3615_v1  ;;  %v1865_v48 = vmul.f32 %v3615_v1, %v3615_v1  ;;  %v1879_v12 = vadd.f32 %v1878_v51, %v1864_v45 }
 0x3df   :  { %v3620_v39 = vpop.f32.mrf.mxu1 }
 0x3e0   :  { %v1880_v15 = vadd.f32 %v1879_v12, %v1865_v48  ;;  %v1844_v46 = vadd.f32 %v3610_v3, %v1843_v22  ;;  %v1868_v62 = vmul.f32 %v3620_v39, %v3620_v39 }
 0x3e1   :  { %v3625_v50 = vpop.f32.mrf.mxu1 }
 0x3e2   :  { %v1845_v21 = vadd.f32 %v1844_v46, %v3625_v50  ;;  %v1867_v6 = vmul.f32 %v3625_v50, %v3625_v50  ;;  %v1881_v58 = vadd.f32 %v1880_v15, %v1866_v23 }
 0x3e3   :  { %v3630_v44 = vpop.f32.mrf.mxu1 }
 0x3e4   :  { %v1882_v16 = vadd.f32 %v1881_v58, %v1867_v6  ;;  %v1846_v59 = vadd.f32 %v3620_v39, %v1845_v21  ;;  %v1870_v32 = vmul.f32 %v3630_v44, %v3630_v44 }
 0x3e5   :  { %v3635_v14 = vpop.f32.mrf.mxu1 }
 0x3e6   :  { %v1847_v42 = vadd.f32 %v1846_v59, %v3635_v14  ;;  %v1869_v13 = vmul.f32 %v3635_v14, %v3635_v14  ;;  %v1883_v38 = vadd.f32 %v1882_v16, %v1868_v62 }
 0x3e7   :  { %v3640_v52 = vpop.f32.mrf.mxu1 }
 0x3e8   :  { %v1884_v61 = vadd.f32 %v1883_v38, %v1869_v13  ;;  %v1848_v5 = vadd.f32 %v3630_v44, %v1847_v42  ;;  %v1872_v20 = vmul.f32 %v3640_v52, %v3640_v52 }
 0x3e9   :  { %v3645_v18 = vpop.f32.mrf.mxu1 }
 0x3ea   :  { %v1849_v17 = vadd.f32 %v1848_v5, %v3645_v18  ;;  %v1871_v63 = vmul.f32 %v3645_v18, %v3645_v18  ;;  %v1885_v9 = vadd.f32 %v1884_v61, %v1870_v32 }
 0x3eb   :  { %v3650_v7 = vpop.f32.mrf.mxu1 }
 0x3ec   :  { %v1886_v24 = vadd.f32 %v1885_v9, %v1871_v63  ;;  %v1850_v34 = vadd.f32 %v3640_v52, %v1849_v17  ;;  %v1874_v28 = vmul.f32 %v3650_v7, %v3650_v7 }
 0x3ed   :  { %v1829_v29 = vpop.f32.mrf.mxu1 }
 0x3ee   :  { %v1851_v33 = vadd.f32 %v1850_v34, %v1829_v29  ;;  %v1873_v40 = vmul.f32 %v1829_v29, %v1829_v29  ;;  %v1887_v43 = vadd.f32 %v1886_v24, %v1872_v20 }
 0x3f0   :  { %v1852_v41 = vadd.f32 %v3650_v7, %v1851_v33  ;;  %v1888_v36 = vadd.f32 %v1887_v43, %v1873_v40  ;;  %v3753_v40 = vld [vmem:[#allocation20_spill] sm:$0xff] }
 0x3f2   :  { %v1853_v19 = vrot.slane %v1852_v41, 4  ;;  %v1889_v11 = vadd.f32 %v1888_v36, %v1874_v28  ;;  %v3754_v28 = vld [vmem:[#allocation21_spill] sm:$0xff]  ;;  %v3755_v36 = vld [vmem:[#allocation22_spill] sm:$0xff] }
 0x3f4   :  { %v1854_v0 = vadd.f32 %v1853_v19, %v1852_v41  ;;  %v1890_v31 = vrot.slane %v1889_v11, 4 }
 0x3f6   :  { %v1855_v55 = vrot.slane %v1854_v0, 2  ;;  %v1891_v53 = vadd.f32 %v1890_v31, %v1889_v11  ;;  %v3756_v11 = vld [vmem:[#allocation23_spill] sm:$0xff]  ;;  %v3757_v31 = vld [vmem:[#allocation24_spill] sm:$0xff] }
 0x3f8   :  { %v1856_v8 = vadd.f32 %v1855_v55, %v1854_v0  ;;  %v1892_v2 = vrot.slane %v1891_v53, 2 }
 0x3fa   :  { %v1857_v47 = vrot.slane %v1856_v8, 1  ;;  %v1893_v49 = vadd.f32 %v1892_v2, %v1891_v53  ;;  %v3758_v53 = vld [vmem:[#allocation25_spill] sm:$0xff]  ;;  %v3759_v2 = vld [vmem:[#allocation26_spill] sm:$0xff] }
 0x3fc   :  { %v1858_v37 = vadd.f32 %v1857_v47, %v1856_v8  ;;  %v1894_v30 = vrot.slane %v1893_v49, 1 }
 0x3fe   :  { %v1895_v60 = vadd.f32 %v1894_v30, %v1893_v49  ;;  %v1896_v26 = vmul.f32 0.0078125, %v1858_v37  ;;  %v3760_v49 = vld [vmem:[#allocation27_spill] sm:$0xff]  ;;  %v3761_v30 = vld [vmem:[#allocation28_spill] sm:$0xff] }
 0x400   :  { %v1897_v35 = vmul.f32 0.0078125, %v1895_v60  ;;  %v1898_v45 = vmul.f32 %v1896_v26, %v1896_v26  ;;  %v1915_v48 = vsub.f32 %v1829_v29, %v1896_v26  ;;  %v1901_v12 = vsub.f32 %v3585_v56, %v1896_v26  ;;  %v3752_v29 = vld [vmem:[#allocation19_spill] sm:$0xff] }
 0x401   :  { %v1902_v23 = vsub.f32 %v3583_v25, %v1896_v26  ;;  %v1903_v15 = vsub.f32 %v3595_v10, %v1896_v26  ;;  %v1904_v46 = vsub.f32 %v3589_v57, %v1896_v26  ;;  %v1905_v21 = vsub.f32 %v3605_v54, %v1896_v26 }
 0x402   :  { %v1899_v51 = vsub.f32 %v1897_v35, %v1898_v45  ;;  %v1906_v6 = vsub.f32 %v3600_v4, %v1896_v26  ;;  %v1907_v58 = vsub.f32 %v3615_v1, %v1896_v26  ;;  %v1908_v62 = vsub.f32 %v3610_v3, %v1896_v26  ;;  %v3763_v45 = vld [vmem:[#allocation30_spill] sm:$0xff] }
 0x403   :  { %v1909_v16 = vsub.f32 %v3625_v50, %v1896_v26  ;;  %v1910_v59 = vsub.f32 %v3620_v39, %v1896_v26  ;;  %v1911_v56 = vsub.f32 %v3635_v14, %v1896_v26  ;;  %v1912_v25 = vsub.f32 %v3630_v44, %v1896_v26  ;;  %v3750_v39 = vld [vmem:[#allocation17_spill] sm:$0xff] }
 0x404   :  { %v1900_v27 = vmax.f32 %v1899_v51, 0.0  ;;  %v1913_v10 = vsub.f32 %v3645_v18, %v1896_v26  ;;  %v1914_v57 = vsub.f32 %v3640_v52, %v1896_v26  ;;  %v1916_v54 = vsub.f32 %v3650_v7, %v1896_v26  ;;  %v3751_v7 = vld [vmem:[#allocation18_spill] sm:$0xff]  ;;  %v3762_v26 = vld [vmem:[#allocation29_spill] sm:$0xff] }
 0x406   :  { %v1917_v22 = vadd.f32 1e-05, %v1900_v27  ;;  %v3764_v27 = vld [vmem:[#allocation31_spill] sm:$0xff] }
 0x408   :  { %2514 = vrsqrt.f32 %v1917_v22 }
 0x415   :  { %v2515_v42 = vpop.eup %2514 }
 0x416   :  { %v1933_v4 = vmul.f32 %v2515_v42, %v1915_v48  ;;  %v1919_v13 = vmul.f32 %v2515_v42, %v1901_v12  ;;  %v1920_v1 = vmul.f32 %v2515_v42, %v1902_v23  ;;  %v1921_v38 = vmul.f32 %v2515_v42, %v1903_v15  ;;  %v3765_v48 = vld [vmem:[#allocation16_spill] sm:$0xff] }
 0x417   :  { %v1922_v3 = vmul.f32 %v2515_v42, %v1904_v46  ;;  %v1923_v32 = vmul.f32 %v2515_v42, %v1905_v21  ;;  %v1924_v50 = vmul.f32 %v2515_v42, %v1906_v6  ;;  %v1925_v61 = vmul.f32 %v2515_v42, %v1907_v58 }
 0x418   :  { %v1949_v5 = vadd.f32 %v1933_v4, %v3750_v39  ;;  %v1926_v14 = vmul.f32 %v2515_v42, %v1908_v62  ;;  %v1927_v17 = vmul.f32 %v2515_v42, %v1909_v16  ;;  %v1928_v63 = vmul.f32 %v2515_v42, %v1910_v59 }
 0x419   :  { %v1929_v44 = vmul.f32 %v2515_v42, %v1911_v56  ;;  %v1930_v9 = vmul.f32 %v2515_v42, %v1912_v25  ;;  %v1931_v18 = vmul.f32 %v2515_v42, %v1913_v10  ;;  %v1932_v20 = vmul.f32 %v2515_v42, %v1914_v57 }
 0x41a   :  { %v1965_v52 = vmax.f32 %v1949_v5, 0.0  ;;  %v1934_v24 = vmul.f32 %v2515_v42, %v1916_v54  ;;  %v1935_v34 = vadd.f32 %v1919_v13, %v3751_v7  ;;  %v1936_v33 = vadd.f32 %v1920_v1, %v3752_v29 }
 0x41b   :  { %v1937_v43 = vadd.f32 %v1921_v38, %v3753_v40  ;;  %v1938_v41 = vadd.f32 %v1922_v3, %v3754_v28  ;;  %v1939_v19 = vadd.f32 %v1923_v32, %v3755_v36  ;;  %v1940_v0 = vadd.f32 %v1924_v50, %v3756_v11 }
 0x41c   :  { %1981 = vst [vmem:[#allocation11 + $0x70] sm:$0xff] %v1965_v52  ;;  %v1941_v55 = vadd.f32 %v1925_v61, %v3757_v31  ;;  %v1942_v8 = vadd.f32 %v1926_v14, %v3758_v53  ;;  %v1943_v47 = vadd.f32 %v1927_v17, %v3759_v2  ;;  %v1944_v37 = vadd.f32 %v1928_v63, %v3760_v49 }
 0x41d   :  { %v1945_v60 = vadd.f32 %v1929_v44, %v3761_v30  ;;  %v1946_v35 = vadd.f32 %v1930_v9, %v3762_v26  ;;  %v1947_v51 = vadd.f32 %v1931_v18, %v3763_v45  ;;  %v1948_v22 = vadd.f32 %v1932_v20, %v3764_v27 }
 0x41e   :  { %v1950_v12 = vadd.f32 %v1934_v24, %v3765_v48  ;;  %v1951_v23 = vmax.f32 %v1935_v34, 0.0  ;;  %v1952_v15 = vmax.f32 %v1936_v33, 0.0  ;;  %v1953_v46 = vmax.f32 %v1937_v43, 0.0 }
 0x41f   :  { %v1954_v21 = vmax.f32 %v1938_v41, 0.0  ;;  %v1955_v6 = vmax.f32 %v1939_v19, 0.0  ;;  %v1956_v58 = vmax.f32 %v1940_v0, 0.0  ;;  %v1957_v62 = vmax.f32 %v1941_v55, 0.0 }
 0x420   :  { %v1958_v16 = vmax.f32 %v1942_v8, 0.0  ;;  %v1959_v59 = vmax.f32 %v1943_v47, 0.0  ;;  %v1960_v56 = vmax.f32 %v1944_v37, 0.0  ;;  %v1961_v42 = vmax.f32 %v1945_v60, 0.0  ;;  %1967 = vst [vmem:[#allocation11] sm:$0xff] %v1951_v23  ;;  %1968 = vst [vmem:[#allocation11 + $0x8] sm:$0xff] %v1952_v15 }
 0x421   :  { %1969 = vst [vmem:[#allocation11 + $0x10] sm:$0xff] %v1953_v46  ;;  %v1962_v25 = vmax.f32 %v1946_v35, 0.0  ;;  %v1963_v10 = vmax.f32 %v1947_v51, 0.0  ;;  %v1964_v57 = vmax.f32 %v1948_v22, 0.0  ;;  %v1966_v54 = vmax.f32 %v1950_v12, 0.0  ;;  %1970 = vst [vmem:[#allocation11 + $0x18] sm:$0xff] %v1954_v21 }
 0x422   :  { %1971 = vst [vmem:[#allocation11 + $0x20] sm:$0xff] %v1955_v6  ;;  %1972 = vst [vmem:[#allocation11 + $0x28] sm:$0xff] %v1956_v58 }
 0x423   :  { %1973 = vst [vmem:[#allocation11 + $0x30] sm:$0xff] %v1957_v62  ;;  %1974 = vst [vmem:[#allocation11 + $0x38] sm:$0xff] %v1958_v16 }
 0x424   :  { %1975 = vst [vmem:[#allocation11 + $0x40] sm:$0xff] %v1959_v59  ;;  %1976 = vst [vmem:[#allocation11 + $0x48] sm:$0xff] %v1960_v56 }
 0x425   :  { %1977 = vst [vmem:[#allocation11 + $0x50] sm:$0xff] %v1961_v42  ;;  %1978 = vst [vmem:[#allocation11 + $0x58] sm:$0xff] %v1962_v25 }
 0x426   :  { %1979 = vst [vmem:[#allocation11 + $0x60] sm:$0xff] %v1963_v10  ;;  %1980 = vst [vmem:[#allocation11 + $0x68] sm:$0xff] %v1964_v57 }
 0x427   :  { %1982 = vst [vmem:[#allocation11 + $0x78] sm:$0xff] %v1966_v54 }
 0x428   :  { %2608 = shalt.err (!%p2605_p10)
}
 0x429   :  { %1994 = dma.vmem_to_hbm [thread:$0]  %s1989_s3, 2048, %s3699_s4, [#allocation5], %s2629_s25, %s2629_s25, %s2630_s26  }
 0x42a   :  { %2623 = dma.done.wait [#allocation5], 2048  }
 0x42b   :  { %2624 = vsyncadd [#allocation5], 4294965248 }
 0x42c   :  { %1998 = vsyncpa [#allocation4], 1 }
 0x42d   :  { %1999 = vsyncpa [#allocation7], 1 }
 0x42e   :  { %2000 = vsyncpa [#allocation10], 1 }
 0x42f   :  { %2001 = vsyncpa [#allocation5], 1 }

</bundles_post_ra>
